<compile_context>
chip_gen: v7x
topology: tpu7x:2x2x1
jax: 0.10.0
libtpu: 0.0.40
codegen_flags: <defaults>
</compile_context>

<pallas_src>
import functools

import numpy as np
import jax
import jax.numpy as jnp
from jax.experimental import pallas as pl
from jax.experimental.pallas import tpu as pltpu

FEATURE_LEN = 25
FUNNEL_SIZE = 8
NUM_CONV = 2
WIDTH = 1024
BN_EPS = 1e-5

_INV_SQRT2 = 0.7071067811865476
_SQRT_2_OVER_PI = 0.7978845608028654


def _round_up(n, m):
    return ((n + m - 1) // m) * m


# ----------------------------- activations ---------------------------------
def _softplus(x):
    # torch.nn.Softplus(beta=1, threshold=20)
    return jnp.where(x > 20.0, x, jnp.log(1.0 + jnp.exp(jnp.minimum(x, 20.0))))


def _erf_f32(x):
    # Abramowitz & Stegun 7.1.26 (|err| <= 1.5e-7).  Uses only mul/add/exp/
    # where, so it does not depend on an erf primitive lowering in Mosaic.
    p = 0.3275911
    a1, a2, a3, a4, a5 = (0.254829592, -0.284496736, 1.421413741,
                          -1.453152027, 1.061405429)
    ax = jnp.abs(x)
    t = 1.0 / (1.0 + p * ax)
    poly = t * (a1 + t * (a2 + t * (a3 + t * (a4 + t * a5))))
    y = 1.0 - poly * jnp.exp(-ax * ax)
    return jnp.where(x < 0.0, -y, y)


def _gelu_exact(x):
    # torch.nn.GELU() default (erf-based)
    return 0.5 * x * (1.0 + _erf_f32(x * _INV_SQRT2))


def _gelu_tanh(x):
    # tanh-approx GELU: single EUP tanh per element (numerics deviate ~1e-3
    # from the exact erf form — opt-in only).
    return 0.5 * x * (1.0 + jnp.tanh(_SQRT_2_OVER_PI * (x + 0.044715 * x * x * x)))


# ------------------------------- kernel -------------------------------------
def atom_pool_gnn_kernel(x_ref,
                         cw0_ref, cv0_ref, cw1_ref, cv1_ref,
                         w1_ref, b1_ref, w2_ref, b2_ref,
                         w3_ref, b3_ref, w4_ref, b4_ref,
                         out_ref, *, gelu_approximate=False):
    F = FEATURE_LEN
    tb = x_ref.shape[0]                     # batch-tile rows (static)

    # Stacked conv operand: rows 0:TB are direction cat(a1, a2) (= the input
    # block unchanged), rows TB:2TB are the swapped direction cat(a2, a1).
    x12 = x_ref[...]                                            # (TB, 2F)
    x21 = jnp.concatenate([x12[:, F:], x12[:, :F]], axis=1)     # (TB, 2F)
    xs = jnp.concatenate([x12, x21], axis=0)                    # (2TB, 2F)

    conv_layers = ((cw0_ref, cv0_ref), (cw1_ref, cv1_ref))
    out = None
    for li, (cw_ref, cv_ref) in enumerate(conv_layers):
        # cw_ref: (2F, 2F) fused Linear weight, stored (in, out)
        # cv_ref: (4, 2F)  [bn1_scale, bn1_shift(+bias), bn2_scale|pad, bn2_shift|pad]
        cv = cv_ref[...]
        g = jnp.dot(xs, cw_ref[...], preferred_element_type=jnp.float32)
        g = g * cv[0:1, :] + cv[1:2, :]                         # Linear bias + BN1 (folded)
        filt = jax.nn.sigmoid(g[:, :F])
        core = _softplus(g[:, F:])
        sumed = (filt * core) * cv[2:3, :F] + cv[3:4, :F]       # BN2 (folded)
        out = _softplus(xs[:, :F] + sumed)                      # (2TB, F)
        if li + 1 < len(conv_layers):
            # next stacked operand: [cat(a1', a2'); cat(a2', a1')]
            swapped = jnp.concatenate([out[tb:], out[:tb]], axis=0)
            xs = jnp.concatenate([out, swapped], axis=1)

    pooled = 0.5 * (out[:tb] + out[tb:])    # mean over the stack dim, (TB, F)

    gelu = _gelu_tanh if gelu_approximate else _gelu_exact

    # MLP: bf16 MXU operands, f32 accumulation / elementwise.
    h = gelu(jnp.dot(pooled.astype(jnp.bfloat16), w1_ref[...],
                     preferred_element_type=jnp.float32) + b1_ref[...])
    h = gelu(jnp.dot(h.astype(jnp.bfloat16), w2_ref[...],
                     preferred_element_type=jnp.float32) + b2_ref[...])
    h = gelu(jnp.dot(h.astype(jnp.bfloat16), w3_ref[...],
                     preferred_element_type=jnp.float32) + b3_ref[...])
    # final Linear(16, 1) as a lane reduction (avoids an N=1 matmul)
    out_ref[...] = jnp.sum(h * w4_ref[...], axis=1, keepdims=True) + b4_ref[...]


# ------------------------------- wrapper -------------------------------------
def atom_pool_gnn_forward(x, params, block_b=512, gelu_approximate=False):
    F = FEATURE_LEN
    if x.shape[1] != 2 * F:
        # torch.split(x, feature_len) only uses the first two chunks
        x = x[:, :2 * F]
    B = x.shape[0]

    # Batch tile: multiple of 8 sublanes, capped at block_b.
    block_b = max(8, _round_up(block_b, 8))
    TB = min(block_b, _round_up(B, 8))
    n_tiles = pl.cdiv(B, TB)
    if 1 < n_tiles < 4:
        # Too few grid steps to pipeline DMAs / feed both v7x TensorCores:
        # shrink the tile so the parallel batch axis has >= 4 steps.
        TB = max(8, min(TB, _round_up(pl.cdiv(B, 4), 8)))
        n_tiles = pl.cdiv(B, TB)
    Bp = n_tiles * TB
    if Bp != B:
        x = jnp.pad(x, ((0, Bp - B), (0, 0)))

    (cw0, cv0), (cw1, cv1) = params["conv"]
    (w1, b1), (w2, b2), (w3, b3), (w4, b4) = params["mlp"]

    weights = (cw0, cv0, cw1, cv1,
               w1.astype(jnp.bfloat16), b1,
               w2.astype(jnp.bfloat16), b2,
               w3.astype(jnp.bfloat16), b3,
               w4.T,                      # (1, 16) for the lane reduction
               b4)

    def resident_spec(a):
        # Full-array block with a constant index map -> fetched once and kept
        # VMEM-resident across all batch tiles.
        return pl.BlockSpec(a.shape, lambda i, n=a.ndim: (0,) * n)

    kernel = functools.partial(atom_pool_gnn_kernel,
                               gelu_approximate=gelu_approximate)

    out = pl.pallas_call(
        kernel,
        out_shape=jax.ShapeDtypeStruct((Bp, 1), jnp.float32),
        grid=(n_tiles,),
        in_specs=([pl.BlockSpec((TB, 2 * F), lambda i: (i, 0))]
                  + [resident_spec(a) for a in weights]),
        out_specs=pl.BlockSpec((TB, 1), lambda i: (i, 0)),
        compiler_params=pltpu.CompilerParams(
            dimension_semantics=("parallel",),       # megacore sharding on v7x
            vmem_limit_bytes=32 * 1024 * 1024),      # covers TB=512..1024 on v5e too
    )(x, *weights)
    return out[:B]


# -------------------------- parameter construction ---------------------------
def init_params(key):
    F = FEATURE_LEN
    keys = jax.random.split(key, NUM_CONV + 4)

    conv_params = []
    for l in range(NUM_CONV):
        kW, kb = jax.random.split(keys[l])
        fan_in = 2 * F
        bound = 1.0 / np.sqrt(fan_in)
        # fused conv Linear weight stored as (in, out) so the kernel does x @ W
        W = jax.random.uniform(kW, (2 * F, 2 * F), jnp.float32, -bound, bound)
        b = jax.random.uniform(kb, (2 * F,), jnp.float32, -bound, bound)
        # eval-mode BatchNorm folded into per-channel scale/shift (default init)
        s1 = jnp.ones((2 * F,), jnp.float32) / jnp.sqrt(1.0 + BN_EPS)
        t1 = jnp.zeros((2 * F,), jnp.float32)
        s2 = jnp.ones((F,), jnp.float32) / jnp.sqrt(1.0 + BN_EPS)
        t2 = jnp.zeros((F,), jnp.float32)
        # fold Linear bias into the BN1 shift: (xW + b)*s1 + t1 = xW*s1 + (b*s1 + t1)
        shift1 = b * s1 + t1
        cv = jnp.zeros((4, 2 * F), jnp.float32)
        cv = cv.at[0].set(s1)
        cv = cv.at[1].set(shift1)
        cv = cv.at[2, :F].set(s2)
        cv = cv.at[3, :F].set(t2)
        conv_params.append((W, cv))

    dims = [F, WIDTH, WIDTH // FUNNEL_SIZE, WIDTH // FUNNEL_SIZE // FUNNEL_SIZE, 1]
    mlp_params = []
    for i in range(4):
        kW, kb = jax.random.split(keys[NUM_CONV + i])
        bound = 1.0 / np.sqrt(dims[i])
        W = jax.random.uniform(kW, (dims[i], dims[i + 1]), jnp.float32, -bound, bound)
        bvec = jax.random.uniform(kb, (1, dims[i + 1]), jnp.float32, -bound, bound)
        mlp_params.append((W, bvec))

    return {"conv": conv_params, "mlp": mlp_params}


# --------------------------- pure-JAX reference -------------------------------
def reference_forward(x, params, gelu_approximate=False):
    F = FEATURE_LEN
    a1, a2 = x[:, :F], x[:, F:2 * F]

    def direction(p, q, W, cv):
        g = jnp.concatenate([p, q], axis=1) @ W
        g = g * cv[0:1, :] + cv[1:2, :]
        filt = jax.nn.sigmoid(g[:, :F])
        core = _softplus(g[:, F:])
        sumed = (filt * core) * cv[2:3, :F] + cv[3:4, :F]
        return _softplus(p + sumed)

    for W, cv in params["conv"]:
        a1, a2 = direction(a1, a2, W, cv), direction(a2, a1, W, cv)

    pooled = 0.5 * (a1 + a2)

    if gelu_approximate:
        gelu = lambda z: 0.5 * z * (1.0 + jnp.tanh(_SQRT_2_OVER_PI *
                                                   (z + 0.044715 * z ** 3)))
    else:
        gelu = lambda z: 0.5 * z * (1.0 + jax.scipy.special.erf(z * _INV_SQRT2))

    (w1, b1), (w2, b2), (w3, b3), (w4, b4) = params["mlp"]
    h = gelu(pooled @ w1 + b1)
    h = gelu(h @ w2 + b2)
    h = gelu(h @ w3 + b3)
    return h @ w4 + b4


# --------------------------------- main ---------------------------------------
if __name__ == "__main__":
    key = jax.random.PRNGKey(0)
    kx, kp = jax.random.split(key)
    params = init_params(kp)

    # Small shape consistent with the module: (batch, 2 * FEATURE_LEN)
    B = 8
    x = jax.random.normal(kx, (B, 2 * FEATURE_LEN), dtype=jnp.float32)
    out = jax.block_until_ready(atom_pool_gnn_forward(x, params))
    ref = reference_forward(x, params)
    np.testing.assert_allclose(np.asarray(out), np.asarray(ref), rtol=2e-2, atol=2e-2)
    assert out.shape == (B, 1) and out.dtype == jnp.float32

    # Exercise the tiled / padded multi-step grid path and the tile-shrink
    # heuristic (600 rows -> TB=152, 4 grid steps, 8 padded rows).
    B2 = 600
    x2 = jax.random.normal(jax.random.PRNGKey(1), (B2, 2 * FEATURE_LEN),
                           dtype=jnp.float32)
    out2 = jax.block_until_ready(atom_pool_gnn_forward(x2, params, block_b=512))
    ref2 = reference_forward(x2, params)
    np.testing.assert_allclose(np.asarray(out2), np.asarray(ref2),
                               rtol=2e-2, atol=2e-2)
    assert out2.shape == (B2, 1)

    # Optional tanh-approx GELU path (explicit numerics decision).
    out3 = jax.block_until_ready(
        atom_pool_gnn_forward(x, params, gelu_approximate=True))
    ref3 = reference_forward(x, params, gelu_approximate=True)
    np.testing.assert_allclose(np.asarray(out3), np.asarray(ref3),
                               rtol=2e-2, atol=2e-2)

    print("KERNEL_OK")
</pallas_src>

<mosaic_0001>
module attributes {stable_mosaic.version = 11 : i64} {
  func.func @atom_pool_gnn_kernel(%arg0: i32, %arg1: memref<8x50xf32, #tpu.memory_space<vmem>>, %arg2: memref<50x50xf32, #tpu.memory_space<vmem>>, %arg3: memref<4x50xf32, #tpu.memory_space<vmem>>, %arg4: memref<50x50xf32, #tpu.memory_space<vmem>>, %arg5: memref<4x50xf32, #tpu.memory_space<vmem>>, %arg6: memref<25x1024xbf16, #tpu.memory_space<vmem>>, %arg7: memref<1x1024xf32, #tpu.memory_space<vmem>>, %arg8: memref<1024x128xbf16, #tpu.memory_space<vmem>>, %arg9: memref<1x128xf32, #tpu.memory_space<vmem>>, %arg10: memref<128x16xbf16, #tpu.memory_space<vmem>>, %arg11: memref<1x16xf32, #tpu.memory_space<vmem>>, %arg12: memref<1x16xf32, #tpu.memory_space<vmem>>, %arg13: memref<1x1xf32, #tpu.memory_space<vmem>>, %arg14: memref<8x1xf32, #tpu.memory_space<vmem>>) attributes {dimension_semantics = [#tpu.dimension_semantics<parallel>], iteration_bounds = array<i64: 1>, scalar_prefetch = 0 : i64, scratch_operands = 0 : i64, tpu.core_type = #tpu.core_type<tc>, window_params = [{transform_indices = @transform_0, window_bounds = array<i64: 8, 50>}, {pipeline_mode = #tpu.pipeline_mode<synchronous>, transform_indices = @transform_1, window_bounds = array<i64: 50, 50>}, {pipeline_mode = #tpu.pipeline_mode<synchronous>, transform_indices = @transform_2, window_bounds = array<i64: 4, 50>}, {pipeline_mode = #tpu.pipeline_mode<synchronous>, transform_indices = @transform_3, window_bounds = array<i64: 50, 50>}, {pipeline_mode = #tpu.pipeline_mode<synchronous>, transform_indices = @transform_4, window_bounds = array<i64: 4, 50>}, {pipeline_mode = #tpu.pipeline_mode<synchronous>, transform_indices = @transform_5, window_bounds = array<i64: 25, 1024>}, {pipeline_mode = #tpu.pipeline_mode<synchronous>, transform_indices = @transform_6, window_bounds = array<i64: 1, 1024>}, {pipeline_mode = #tpu.pipeline_mode<synchronous>, transform_indices = @transform_7, window_bounds = array<i64: 1024, 128>}, {pipeline_mode = #tpu.pipeline_mode<synchronous>, transform_indices = @transform_8, window_bounds = array<i64: 1, 128>}, {pipeline_mode = #tpu.pipeline_mode<synchronous>, transform_indices = @transform_9, window_bounds = array<i64: 128, 16>}, {pipeline_mode = #tpu.pipeline_mode<synchronous>, transform_indices = @transform_10, window_bounds = array<i64: 1, 16>}, {pipeline_mode = #tpu.pipeline_mode<synchronous>, transform_indices = @transform_11, window_bounds = array<i64: 1, 16>}, {pipeline_mode = #tpu.pipeline_mode<synchronous>, transform_indices = @transform_12, window_bounds = array<i64: 1, 1>}, {transform_indices = @transform_13, window_bounds = array<i64: 8, 1>}]} {
    %c0 = arith.constant 0 : index
    %c0_0 = arith.constant 0 : index
    %0 = vector.load %arg1[%c0, %c0_0] : memref<8x50xf32, #tpu.memory_space<vmem>>, vector<8x50xf32>
    %1 = vector.extract_strided_slice %0 {offsets = [0, 25], sizes = [8, 25], strides = [1, 1]} : vector<8x50xf32> to vector<8x25xf32>
    %2 = vector.extract_strided_slice %0 {offsets = [0, 0], sizes = [8, 25], strides = [1, 1]} : vector<8x50xf32> to vector<8x25xf32>
    %3 = tpu.concatenate %1, %2 in 1 : vector<8x25xf32>, vector<8x25xf32> -> vector<8x50xf32>
    %4 = tpu.concatenate %0, %3 in 0 : vector<8x50xf32>, vector<8x50xf32> -> vector<16x50xf32>
    %c0_1 = arith.constant 0 : index
    %c0_2 = arith.constant 0 : index
    %5 = vector.load %arg3[%c0_1, %c0_2] : memref<4x50xf32, #tpu.memory_space<vmem>>, vector<4x50xf32>
    %c0_3 = arith.constant 0 : index
    %c0_4 = arith.constant 0 : index
    %6 = vector.load %arg2[%c0_3, %c0_4] : memref<50x50xf32, #tpu.memory_space<vmem>>, vector<50x50xf32>
    %cst = arith.constant dense<0.000000e+00> : vector<16x50xf32>
    %7 = tpu.matmul %4, %6, %cst {dimension_numbers = #tpu.dot_dimension_numbers<[1], [0], [0], [1], [0, 0, 1, 1], [], []>} : vector<16x50xf32>, vector<50x50xf32>, vector<16x50xf32> -> vector<16x50xf32>
    %8 = vector.extract_strided_slice %5 {offsets = [0, 0], sizes = [1, 50], strides = [1, 1]} : vector<4x50xf32> to vector<1x50xf32>
    %9 = vector.broadcast %8 : vector<1x50xf32> to vector<16x50xf32>
    %10 = arith.mulf %7, %9 : vector<16x50xf32>
    %11 = vector.extract_strided_slice %5 {offsets = [1, 0], sizes = [1, 50], strides = [1, 1]} : vector<4x50xf32> to vector<1x50xf32>
    %12 = vector.broadcast %11 : vector<1x50xf32> to vector<16x50xf32>
    %13 = arith.addf %10, %12 : vector<16x50xf32>
    %14 = vector.extract_strided_slice %13 {offsets = [0, 0], sizes = [16, 25], strides = [1, 1]} : vector<16x50xf32> to vector<16x25xf32>
    %15 = arith.negf %14 : vector<16x25xf32>
    %16 = math.exp %15 : vector<16x25xf32>
    %cst_5 = arith.constant 1.000000e+00 : f32
    %17 = vector.broadcast %cst_5 : f32 to vector<16x25xf32>
    %18 = arith.addf %17, %16 : vector<16x25xf32>
    %19 = arith.divf %17, %18 : vector<16x25xf32>
    %20 = vector.extract_strided_slice %13 {offsets = [0, 25], sizes = [16, 25], strides = [1, 1]} : vector<16x50xf32> to vector<16x25xf32>
    %cst_6 = arith.constant 2.000000e+01 : f32
    %21 = vector.broadcast %cst_6 : f32 to vector<16x25xf32>
    %22 = arith.cmpf ogt, %20, %21 : vector<16x25xf32>
    %cst_7 = arith.constant 2.000000e+01 : f32
    %23 = vector.broadcast %cst_7 : f32 to vector<16x25xf32>
    %24 = arith.minimumf %20, %23 : vector<16x25xf32>
    %25 = math.exp %24 : vector<16x25xf32>
    %cst_8 = arith.constant 1.000000e+00 : f32
    %26 = vector.broadcast %cst_8 : f32 to vector<16x25xf32>
    %27 = arith.addf %26, %25 : vector<16x25xf32>
    %28 = math.log %27 : vector<16x25xf32>
    %29 = arith.select %22, %20, %28 : vector<16x25xi1>, vector<16x25xf32>
    %30 = arith.mulf %19, %29 : vector<16x25xf32>
    %31 = vector.extract_strided_slice %5 {offsets = [2, 0], sizes = [1, 25], strides = [1, 1]} : vector<4x50xf32> to vector<1x25xf32>
    %32 = vector.broadcast %31 : vector<1x25xf32> to vector<16x25xf32>
    %33 = arith.mulf %30, %32 : vector<16x25xf32>
    %34 = vector.extract_strided_slice %5 {offsets = [3, 0], sizes = [1, 25], strides = [1, 1]} : vector<4x50xf32> to vector<1x25xf32>
    %35 = vector.broadcast %34 : vector<1x25xf32> to vector<16x25xf32>
    %36 = arith.addf %33, %35 : vector<16x25xf32>
    %37 = vector.extract_strided_slice %4 {offsets = [0, 0], sizes = [16, 25], strides = [1, 1]} : vector<16x50xf32> to vector<16x25xf32>
    %38 = arith.addf %37, %36 : vector<16x25xf32>
    %cst_9 = arith.constant 2.000000e+01 : f32
    %39 = vector.broadcast %cst_9 : f32 to vector<16x25xf32>
    %40 = arith.cmpf ogt, %38, %39 : vector<16x25xf32>
    %cst_10 = arith.constant 2.000000e+01 : f32
    %41 = vector.broadcast %cst_10 : f32 to vector<16x25xf32>
    %42 = arith.minimumf %38, %41 : vector<16x25xf32>
    %43 = math.exp %42 : vector<16x25xf32>
    %cst_11 = arith.constant 1.000000e+00 : f32
    %44 = vector.broadcast %cst_11 : f32 to vector<16x25xf32>
    %45 = arith.addf %44, %43 : vector<16x25xf32>
    %46 = math.log %45 : vector<16x25xf32>
    %47 = arith.select %40, %38, %46 : vector<16x25xi1>, vector<16x25xf32>
    %48 = vector.extract_strided_slice %47 {offsets = [8, 0], sizes = [8, 25], strides = [1, 1]} : vector<16x25xf32> to vector<8x25xf32>
    %49 = vector.extract_strided_slice %47 {offsets = [0, 0], sizes = [8, 25], strides = [1, 1]} : vector<16x25xf32> to vector<8x25xf32>
    %50 = tpu.concatenate %48, %49 in 0 : vector<8x25xf32>, vector<8x25xf32> -> vector<16x25xf32>
    %51 = tpu.concatenate %47, %50 in 1 : vector<16x25xf32>, vector<16x25xf32> -> vector<16x50xf32>
    %c0_12 = arith.constant 0 : index
    %c0_13 = arith.constant 0 : index
    %52 = vector.load %arg5[%c0_12, %c0_13] : memref<4x50xf32, #tpu.memory_space<vmem>>, vector<4x50xf32>
    %c0_14 = arith.constant 0 : index
    %c0_15 = arith.constant 0 : index
    %53 = vector.load %arg4[%c0_14, %c0_15] : memref<50x50xf32, #tpu.memory_space<vmem>>, vector<50x50xf32>
    %cst_16 = arith.constant dense<0.000000e+00> : vector<16x50xf32>
    %54 = tpu.matmul %51, %53, %cst_16 {dimension_numbers = #tpu.dot_dimension_numbers<[1], [0], [0], [1], [0, 0, 1, 1], [], []>} : vector<16x50xf32>, vector<50x50xf32>, vector<16x50xf32> -> vector<16x50xf32>
    %55 = vector.extract_strided_slice %52 {offsets = [0, 0], sizes = [1, 50], strides = [1, 1]} : vector<4x50xf32> to vector<1x50xf32>
    %56 = vector.broadcast %55 : vector<1x50xf32> to vector<16x50xf32>
    %57 = arith.mulf %54, %56 : vector<16x50xf32>
    %58 = vector.extract_strided_slice %52 {offsets = [1, 0], sizes = [1, 50], strides = [1, 1]} : vector<4x50xf32> to vector<1x50xf32>
    %59 = vector.broadcast %58 : vector<1x50xf32> to vector<16x50xf32>
    %60 = arith.addf %57, %59 : vector<16x50xf32>
    %61 = vector.extract_strided_slice %60 {offsets = [0, 0], sizes = [16, 25], strides = [1, 1]} : vector<16x50xf32> to vector<16x25xf32>
    %62 = arith.negf %61 : vector<16x25xf32>
    %63 = math.exp %62 : vector<16x25xf32>
    %cst_17 = arith.constant 1.000000e+00 : f32
    %64 = vector.broadcast %cst_17 : f32 to vector<16x25xf32>
    %65 = arith.addf %64, %63 : vector<16x25xf32>
    %66 = arith.divf %64, %65 : vector<16x25xf32>
    %67 = vector.extract_strided_slice %60 {offsets = [0, 25], sizes = [16, 25], strides = [1, 1]} : vector<16x50xf32> to vector<16x25xf32>
    %cst_18 = arith.constant 2.000000e+01 : f32
    %68 = vector.broadcast %cst_18 : f32 to vector<16x25xf32>
    %69 = arith.cmpf ogt, %67, %68 : vector<16x25xf32>
    %cst_19 = arith.constant 2.000000e+01 : f32
    %70 = vector.broadcast %cst_19 : f32 to vector<16x25xf32>
    %71 = arith.minimumf %67, %70 : vector<16x25xf32>
    %72 = math.exp %71 : vector<16x25xf32>
    %cst_20 = arith.constant 1.000000e+00 : f32
    %73 = vector.broadcast %cst_20 : f32 to vector<16x25xf32>
    %74 = arith.addf %73, %72 : vector<16x25xf32>
    %75 = math.log %74 : vector<16x25xf32>
    %76 = arith.select %69, %67, %75 : vector<16x25xi1>, vector<16x25xf32>
    %77 = arith.mulf %66, %76 : vector<16x25xf32>
    %78 = vector.extract_strided_slice %52 {offsets = [2, 0], sizes = [1, 25], strides = [1, 1]} : vector<4x50xf32> to vector<1x25xf32>
    %79 = vector.broadcast %78 : vector<1x25xf32> to vector<16x25xf32>
    %80 = arith.mulf %77, %79 : vector<16x25xf32>
    %81 = vector.extract_strided_slice %52 {offsets = [3, 0], sizes = [1, 25], strides = [1, 1]} : vector<4x50xf32> to vector<1x25xf32>
    %82 = vector.broadcast %81 : vector<1x25xf32> to vector<16x25xf32>
    %83 = arith.addf %80, %82 : vector<16x25xf32>
    %84 = vector.extract_strided_slice %51 {offsets = [0, 0], sizes = [16, 25], strides = [1, 1]} : vector<16x50xf32> to vector<16x25xf32>
    %85 = arith.addf %84, %83 : vector<16x25xf32>
    %cst_21 = arith.constant 2.000000e+01 : f32
    %86 = vector.broadcast %cst_21 : f32 to vector<16x25xf32>
    %87 = arith.cmpf ogt, %85, %86 : vector<16x25xf32>
    %cst_22 = arith.constant 2.000000e+01 : f32
    %88 = vector.broadcast %cst_22 : f32 to vector<16x25xf32>
    %89 = arith.minimumf %85, %88 : vector<16x25xf32>
    %90 = math.exp %89 : vector<16x25xf32>
    %cst_23 = arith.constant 1.000000e+00 : f32
    %91 = vector.broadcast %cst_23 : f32 to vector<16x25xf32>
    %92 = arith.addf %91, %90 : vector<16x25xf32>
    %93 = math.log %92 : vector<16x25xf32>
    %94 = arith.select %87, %85, %93 : vector<16x25xi1>, vector<16x25xf32>
    %95 = vector.extract_strided_slice %94 {offsets = [0, 0], sizes = [8, 25], strides = [1, 1]} : vector<16x25xf32> to vector<8x25xf32>
    %96 = vector.extract_strided_slice %94 {offsets = [8, 0], sizes = [8, 25], strides = [1, 1]} : vector<16x25xf32> to vector<8x25xf32>
    %97 = arith.addf %95, %96 : vector<8x25xf32>
    %cst_24 = arith.constant 5.000000e-01 : f32
    %98 = vector.broadcast %cst_24 : f32 to vector<8x25xf32>
    %99 = arith.mulf %98, %97 : vector<8x25xf32>
    %100 = arith.truncf %99 : vector<8x25xf32> to vector<8x25xbf16>
    %c0_25 = arith.constant 0 : index
    %c0_26 = arith.constant 0 : index
    %101 = vector.load %arg6[%c0_25, %c0_26] : memref<25x1024xbf16, #tpu.memory_space<vmem>>, vector<25x1024xbf16>
    %cst_27 = arith.constant dense<0.000000e+00> : vector<8x1024xf32>
    %102 = tpu.matmul %100, %101, %cst_27 {dimension_numbers = #tpu.dot_dimension_numbers<[1], [0], [0], [1], [0, 0, 1, 1], [], []>} : vector<8x25xbf16>, vector<25x1024xbf16>, vector<8x1024xf32> -> vector<8x1024xf32>
    %c0_28 = arith.constant 0 : index
    %c0_29 = arith.constant 0 : index
    %103 = vector.load %arg7[%c0_28, %c0_29] : memref<1x1024xf32, #tpu.memory_space<vmem>>, vector<1x1024xf32>
    %104 = vector.broadcast %103 : vector<1x1024xf32> to vector<8x1024xf32>
    %105 = arith.addf %102, %104 : vector<8x1024xf32>
    %cst_30 = arith.constant 5.000000e-01 : f32
    %106 = vector.broadcast %cst_30 : f32 to vector<8x1024xf32>
    %107 = arith.mulf %106, %105 : vector<8x1024xf32>
    %cst_31 = arith.constant 0.707106769 : f32
    %108 = vector.broadcast %cst_31 : f32 to vector<8x1024xf32>
    %109 = arith.mulf %105, %108 : vector<8x1024xf32>
    %110 = math.absf %109 : vector<8x1024xf32>
    %cst_32 = arith.constant 0.327591091 : f32
    %111 = vector.broadcast %cst_32 : f32 to vector<8x1024xf32>
    %112 = arith.mulf %111, %110 : vector<8x1024xf32>
    %cst_33 = arith.constant 1.000000e+00 : f32
    %113 = vector.broadcast %cst_33 : f32 to vector<8x1024xf32>
    %114 = arith.addf %113, %112 : vector<8x1024xf32>
    %cst_34 = arith.constant 1.000000e+00 : f32
    %115 = vector.broadcast %cst_34 : f32 to vector<8x1024xf32>
    %116 = arith.divf %115, %114 : vector<8x1024xf32>
    %cst_35 = arith.constant 1.06140542 : f32
    %117 = vector.broadcast %cst_35 : f32 to vector<8x1024xf32>
    %118 = arith.mulf %116, %117 : vector<8x1024xf32>
    %cst_36 = arith.constant -1.45315206 : f32
    %119 = vector.broadcast %cst_36 : f32 to vector<8x1024xf32>
    %120 = arith.addf %119, %118 : vector<8x1024xf32>
    %121 = arith.mulf %116, %120 : vector<8x1024xf32>
    %cst_37 = arith.constant 1.42141378 : f32
    %122 = vector.broadcast %cst_37 : f32 to vector<8x1024xf32>
    %123 = arith.addf %122, %121 : vector<8x1024xf32>
    %124 = arith.mulf %116, %123 : vector<8x1024xf32>
    %cst_38 = arith.constant -0.284496725 : f32
    %125 = vector.broadcast %cst_38 : f32 to vector<8x1024xf32>
    %126 = arith.addf %125, %124 : vector<8x1024xf32>
    %127 = arith.mulf %116, %126 : vector<8x1024xf32>
    %cst_39 = arith.constant 0.254829586 : f32
    %128 = vector.broadcast %cst_39 : f32 to vector<8x1024xf32>
    %129 = arith.addf %128, %127 : vector<8x1024xf32>
    %130 = arith.mulf %116, %129 : vector<8x1024xf32>
    %cst_40 = arith.constant 0.000000e+00 : f32
    %131 = vector.broadcast %cst_40 : f32 to vector<8x1024xf32>
    %132 = arith.subf %131, %110 : vector<8x1024xf32>
    %133 = arith.mulf %132, %110 : vector<8x1024xf32>
    %134 = math.exp %133 : vector<8x1024xf32>
    %135 = arith.mulf %130, %134 : vector<8x1024xf32>
    %cst_41 = arith.constant 1.000000e+00 : f32
    %136 = vector.broadcast %cst_41 : f32 to vector<8x1024xf32>
    %137 = arith.subf %136, %135 : vector<8x1024xf32>
    %cst_42 = arith.constant 0.000000e+00 : f32
    %138 = vector.broadcast %cst_42 : f32 to vector<8x1024xf32>
    %139 = arith.cmpf olt, %109, %138 : vector<8x1024xf32>
    %cst_43 = arith.constant 0.000000e+00 : f32
    %140 = vector.broadcast %cst_43 : f32 to vector<8x1024xf32>
    %141 = arith.subf %140, %137 : vector<8x1024xf32>
    %142 = arith.select %139, %141, %137 : vector<8x1024xi1>, vector<8x1024xf32>
    %cst_44 = arith.constant 1.000000e+00 : f32
    %143 = vector.broadcast %cst_44 : f32 to vector<8x1024xf32>
    %144 = arith.addf %143, %142 : vector<8x1024xf32>
    %145 = arith.mulf %107, %144 : vector<8x1024xf32>
    %146 = arith.truncf %145 : vector<8x1024xf32> to vector<8x1024xbf16>
    %c0_45 = arith.constant 0 : index
    %c0_46 = arith.constant 0 : index
    %147 = vector.load %arg8[%c0_45, %c0_46] : memref<1024x128xbf16, #tpu.memory_space<vmem>>, vector<1024x128xbf16>
    %cst_47 = arith.constant dense<0.000000e+00> : vector<8x128xf32>
    %148 = tpu.matmul %146, %147, %cst_47 {dimension_numbers = #tpu.dot_dimension_numbers<[1], [0], [0], [1], [0, 0, 1, 1], [], []>} : vector<8x1024xbf16>, vector<1024x128xbf16>, vector<8x128xf32> -> vector<8x128xf32>
    %c0_48 = arith.constant 0 : index
    %c0_49 = arith.constant 0 : index
    %149 = vector.load %arg9[%c0_48, %c0_49] : memref<1x128xf32, #tpu.memory_space<vmem>>, vector<1x128xf32>
    %150 = vector.broadcast %149 : vector<1x128xf32> to vector<8x128xf32>
    %151 = arith.addf %148, %150 : vector<8x128xf32>
    %cst_50 = arith.constant 5.000000e-01 : f32
    %152 = vector.broadcast %cst_50 : f32 to vector<8x128xf32>
    %153 = arith.mulf %152, %151 : vector<8x128xf32>
    %cst_51 = arith.constant 0.707106769 : f32
    %154 = vector.broadcast %cst_51 : f32 to vector<8x128xf32>
    %155 = arith.mulf %151, %154 : vector<8x128xf32>
    %156 = math.absf %155 : vector<8x128xf32>
    %cst_52 = arith.constant 0.327591091 : f32
    %157 = vector.broadcast %cst_52 : f32 to vector<8x128xf32>
    %158 = arith.mulf %157, %156 : vector<8x128xf32>
    %cst_53 = arith.constant 1.000000e+00 : f32
    %159 = vector.broadcast %cst_53 : f32 to vector<8x128xf32>
    %160 = arith.addf %159, %158 : vector<8x128xf32>
    %cst_54 = arith.constant 1.000000e+00 : f32
    %161 = vector.broadcast %cst_54 : f32 to vector<8x128xf32>
    %162 = arith.divf %161, %160 : vector<8x128xf32>
    %cst_55 = arith.constant 1.06140542 : f32
    %163 = vector.broadcast %cst_55 : f32 to vector<8x128xf32>
    %164 = arith.mulf %162, %163 : vector<8x128xf32>
    %cst_56 = arith.constant -1.45315206 : f32
    %165 = vector.broadcast %cst_56 : f32 to vector<8x128xf32>
    %166 = arith.addf %165, %164 : vector<8x128xf32>
    %167 = arith.mulf %162, %166 : vector<8x128xf32>
    %cst_57 = arith.constant 1.42141378 : f32
    %168 = vector.broadcast %cst_57 : f32 to vector<8x128xf32>
    %169 = arith.addf %168, %167 : vector<8x128xf32>
    %170 = arith.mulf %162, %169 : vector<8x128xf32>
    %cst_58 = arith.constant -0.284496725 : f32
    %171 = vector.broadcast %cst_58 : f32 to vector<8x128xf32>
    %172 = arith.addf %171, %170 : vector<8x128xf32>
    %173 = arith.mulf %162, %172 : vector<8x128xf32>
    %cst_59 = arith.constant 0.254829586 : f32
    %174 = vector.broadcast %cst_59 : f32 to vector<8x128xf32>
    %175 = arith.addf %174, %173 : vector<8x128xf32>
    %176 = arith.mulf %162, %175 : vector<8x128xf32>
    %cst_60 = arith.constant 0.000000e+00 : f32
    %177 = vector.broadcast %cst_60 : f32 to vector<8x128xf32>
    %178 = arith.subf %177, %156 : vector<8x128xf32>
    %179 = arith.mulf %178, %156 : vector<8x128xf32>
    %180 = math.exp %179 : vector<8x128xf32>
    %181 = arith.mulf %176, %180 : vector<8x128xf32>
    %cst_61 = arith.constant 1.000000e+00 : f32
    %182 = vector.broadcast %cst_61 : f32 to vector<8x128xf32>
    %183 = arith.subf %182, %181 : vector<8x128xf32>
    %cst_62 = arith.constant 0.000000e+00 : f32
    %184 = vector.broadcast %cst_62 : f32 to vector<8x128xf32>
    %185 = arith.cmpf olt, %155, %184 : vector<8x128xf32>
    %cst_63 = arith.constant 0.000000e+00 : f32
    %186 = vector.broadcast %cst_63 : f32 to vector<8x128xf32>
    %187 = arith.subf %186, %183 : vector<8x128xf32>
    %188 = arith.select %185, %187, %183 : vector<8x128xi1>, vector<8x128xf32>
    %cst_64 = arith.constant 1.000000e+00 : f32
    %189 = vector.broadcast %cst_64 : f32 to vector<8x128xf32>
    %190 = arith.addf %189, %188 : vector<8x128xf32>
    %191 = arith.mulf %153, %190 : vector<8x128xf32>
    %192 = arith.truncf %191 : vector<8x128xf32> to vector<8x128xbf16>
    %c0_65 = arith.constant 0 : index
    %c0_66 = arith.constant 0 : index
    %193 = vector.load %arg10[%c0_65, %c0_66] : memref<128x16xbf16, #tpu.memory_space<vmem>>, vector<128x16xbf16>
    %cst_67 = arith.constant dense<0.000000e+00> : vector<8x16xf32>
    %194 = tpu.matmul %192, %193, %cst_67 {dimension_numbers = #tpu.dot_dimension_numbers<[1], [0], [0], [1], [0, 0, 1, 1], [], []>} : vector<8x128xbf16>, vector<128x16xbf16>, vector<8x16xf32> -> vector<8x16xf32>
    %c0_68 = arith.constant 0 : index
    %c0_69 = arith.constant 0 : index
    %195 = vector.load %arg11[%c0_68, %c0_69] : memref<1x16xf32, #tpu.memory_space<vmem>>, vector<1x16xf32>
    %196 = vector.broadcast %195 : vector<1x16xf32> to vector<8x16xf32>
    %197 = arith.addf %194, %196 : vector<8x16xf32>
    %cst_70 = arith.constant 5.000000e-01 : f32
    %198 = vector.broadcast %cst_70 : f32 to vector<8x16xf32>
    %199 = arith.mulf %198, %197 : vector<8x16xf32>
    %cst_71 = arith.constant 0.707106769 : f32
    %200 = vector.broadcast %cst_71 : f32 to vector<8x16xf32>
    %201 = arith.mulf %197, %200 : vector<8x16xf32>
    %202 = math.absf %201 : vector<8x16xf32>
    %cst_72 = arith.constant 0.327591091 : f32
    %203 = vector.broadcast %cst_72 : f32 to vector<8x16xf32>
    %204 = arith.mulf %203, %202 : vector<8x16xf32>
    %cst_73 = arith.constant 1.000000e+00 : f32
    %205 = vector.broadcast %cst_73 : f32 to vector<8x16xf32>
    %206 = arith.addf %205, %204 : vector<8x16xf32>
    %cst_74 = arith.constant 1.000000e+00 : f32
    %207 = vector.broadcast %cst_74 : f32 to vector<8x16xf32>
    %208 = arith.divf %207, %206 : vector<8x16xf32>
    %cst_75 = arith.constant 1.06140542 : f32
    %209 = vector.broadcast %cst_75 : f32 to vector<8x16xf32>
    %210 = arith.mulf %208, %209 : vector<8x16xf32>
    %cst_76 = arith.constant -1.45315206 : f32
    %211 = vector.broadcast %cst_76 : f32 to vector<8x16xf32>
    %212 = arith.addf %211, %210 : vector<8x16xf32>
    %213 = arith.mulf %208, %212 : vector<8x16xf32>
    %cst_77 = arith.constant 1.42141378 : f32
    %214 = vector.broadcast %cst_77 : f32 to vector<8x16xf32>
    %215 = arith.addf %214, %213 : vector<8x16xf32>
    %216 = arith.mulf %208, %215 : vector<8x16xf32>
    %cst_78 = arith.constant -0.284496725 : f32
    %217 = vector.broadcast %cst_78 : f32 to vector<8x16xf32>
    %218 = arith.addf %217, %216 : vector<8x16xf32>
    %219 = arith.mulf %208, %218 : vector<8x16xf32>
    %cst_79 = arith.constant 0.254829586 : f32
    %220 = vector.broadcast %cst_79 : f32 to vector<8x16xf32>
    %221 = arith.addf %220, %219 : vector<8x16xf32>
    %222 = arith.mulf %208, %221 : vector<8x16xf32>
    %cst_80 = arith.constant 0.000000e+00 : f32
    %223 = vector.broadcast %cst_80 : f32 to vector<8x16xf32>
    %224 = arith.subf %223, %202 : vector<8x16xf32>
    %225 = arith.mulf %224, %202 : vector<8x16xf32>
    %226 = math.exp %225 : vector<8x16xf32>
    %227 = arith.mulf %222, %226 : vector<8x16xf32>
    %cst_81 = arith.constant 1.000000e+00 : f32
    %228 = vector.broadcast %cst_81 : f32 to vector<8x16xf32>
    %229 = arith.subf %228, %227 : vector<8x16xf32>
    %cst_82 = arith.constant 0.000000e+00 : f32
    %230 = vector.broadcast %cst_82 : f32 to vector<8x16xf32>
    %231 = arith.cmpf olt, %201, %230 : vector<8x16xf32>
    %cst_83 = arith.constant 0.000000e+00 : f32
    %232 = vector.broadcast %cst_83 : f32 to vector<8x16xf32>
    %233 = arith.subf %232, %229 : vector<8x16xf32>
    %234 = arith.select %231, %233, %229 : vector<8x16xi1>, vector<8x16xf32>
    %cst_84 = arith.constant 1.000000e+00 : f32
    %235 = vector.broadcast %cst_84 : f32 to vector<8x16xf32>
    %236 = arith.addf %235, %234 : vector<8x16xf32>
    %237 = arith.mulf %199, %236 : vector<8x16xf32>
    %c0_85 = arith.constant 0 : index
    %c0_86 = arith.constant 0 : index
    %238 = vector.load %arg12[%c0_85, %c0_86] : memref<1x16xf32, #tpu.memory_space<vmem>>, vector<1x16xf32>
    %239 = vector.broadcast %238 : vector<1x16xf32> to vector<8x16xf32>
    %240 = arith.mulf %237, %239 : vector<8x16xf32>
    %cst_87 = arith.constant dense<0.000000e+00> : vector<8xf32>
    %241 = vector.multi_reduction <add>, %240, %cst_87 [1] : vector<8x16xf32> to vector<8xf32>
    %242 = vector.shape_cast %241 : vector<8xf32> to vector<8x1xf32>
    %c0_88 = arith.constant 0 : index
    %c0_89 = arith.constant 0 : index
    %243 = vector.load %arg13[%c0_88, %c0_89] : memref<1x1xf32, #tpu.memory_space<vmem>>, vector<1x1xf32>
    %244 = vector.broadcast %243 : vector<1x1xf32> to vector<8x1xf32>
    %245 = arith.addf %242, %244 : vector<8x1xf32>
    %c0_90 = arith.constant 0 : index
    %c0_91 = arith.constant 0 : index
    %246 = vector.load %arg14[%c0_90, %c0_91] : memref<8x1xf32, #tpu.memory_space<vmem>>, vector<8x1xf32>
    tpu.vector_store %arg14[%c0_90, %c0_91], %245 {strides = array<i32>} : memref<8x1xf32, #tpu.memory_space<vmem>>, vector<8x1xf32>,
    return
  }
  func.func @transform_0(%arg0: i32) -> (i32, i32) {
    %c0_i32 = arith.constant 0 : i32
    %c0_i32_0 = arith.constant 0 : i32
    return %arg0, %c0_i32 : i32, i32
  }
  func.func @transform_1(%arg0: i32) -> (i32, i32) {
    %c0_i32 = arith.constant 0 : i32
    %c0_i32_0 = arith.constant 0 : i32
    %c0_i32_1 = arith.constant 0 : i32
    return %c0_i32, %c0_i32_0 : i32, i32
  }
  func.func @transform_2(%arg0: i32) -> (i32, i32) {
    %c0_i32 = arith.constant 0 : i32
    %c0_i32_0 = arith.constant 0 : i32
    %c0_i32_1 = arith.constant 0 : i32
    return %c0_i32, %c0_i32_0 : i32, i32
  }
  func.func @transform_3(%arg0: i32) -> (i32, i32) {
    %c0_i32 = arith.constant 0 : i32
    %c0_i32_0 = arith.constant 0 : i32
    %c0_i32_1 = arith.constant 0 : i32
    return %c0_i32, %c0_i32_0 : i32, i32
  }
  func.func @transform_4(%arg0: i32) -> (i32, i32) {
    %c0_i32 = arith.constant 0 : i32
    %c0_i32_0 = arith.constant 0 : i32
    %c0_i32_1 = arith.constant 0 : i32
    return %c0_i32, %c0_i32_0 : i32, i32
  }
  func.func @transform_5(%arg0: i32) -> (i32, i32) {
    %c0_i32 = arith.constant 0 : i32
    %c0_i32_0 = arith.constant 0 : i32
    %c0_i32_1 = arith.constant 0 : i32
    return %c0_i32, %c0_i32_0 : i32, i32
  }
  func.func @transform_6(%arg0: i32) -> (i32, i32) {
    %c0_i32 = arith.constant 0 : i32
    %c0_i32_0 = arith.constant 0 : i32
    %c0_i32_1 = arith.constant 0 : i32
    return %c0_i32, %c0_i32_0 : i32, i32
  }
  func.func @transform_7(%arg0: i32) -> (i32, i32) {
    %c0_i32 = arith.constant 0 : i32
    %c0_i32_0 = arith.constant 0 : i32
    %c0_i32_1 = arith.constant 0 : i32
    return %c0_i32, %c0_i32_0 : i32, i32
  }
  func.func @transform_8(%arg0: i32) -> (i32, i32) {
    %c0_i32 = arith.constant 0 : i32
    %c0_i32_0 = arith.constant 0 : i32
    %c0_i32_1 = arith.constant 0 : i32
    return %c0_i32, %c0_i32_0 : i32, i32
  }
  func.func @transform_9(%arg0: i32) -> (i32, i32) {
    %c0_i32 = arith.constant 0 : i32
    %c0_i32_0 = arith.constant 0 : i32
    %c0_i32_1 = arith.constant 0 : i32
    return %c0_i32, %c0_i32_0 : i32, i32
  }
  func.func @transform_10(%arg0: i32) -> (i32, i32) {
    %c0_i32 = arith.constant 0 : i32
    %c0_i32_0 = arith.constant 0 : i32
    %c0_i32_1 = arith.constant 0 : i32
    return %c0_i32, %c0_i32_0 : i32, i32
  }
  func.func @transform_11(%arg0: i32) -> (i32, i32) {
    %c0_i32 = arith.constant 0 : i32
    %c0_i32_0 = arith.constant 0 : i32
    %c0_i32_1 = arith.constant 0 : i32
    return %c0_i32, %c0_i32_0 : i32, i32
  }
  func.func @transform_12(%arg0: i32) -> (i32, i32) {
    %c0_i32 = arith.constant 0 : i32
    %c0_i32_0 = arith.constant 0 : i32
    %c0_i32_1 = arith.constant 0 : i32
    return %c0_i32, %c0_i32_0 : i32, i32
  }
  func.func @transform_13(%arg0: i32) -> (i32, i32) {
    %c0_i32 = arith.constant 0 : i32
    %c0_i32_0 = arith.constant 0 : i32
    return %arg0, %c0_i32 : i32, i32
  }
}

</mosaic_0001>

<bundles_post_ra>
// kernel: tpu_custom_call.1
= control target key start
LH: loop header
LB: loop body
LE: loop exit
PB: predicated region body
PF: predicated region fallthrough
CT: control target
= control target key end

     0   :  { %s2891_s0 = inlined_call_operand.vmem [shape: f32[8,50], index: 0, kind: input, shape index: {}]   ;;  %s2892_s1 = inlined_call_operand.vmem [shape: f32[50,50], index: 1, kind: input, shape index: {}]   ;;  %s2893_s2 = inlined_call_operand.vmem [shape: f32[4,50], index: 2, kind: input, shape index: {}]   ;;  %s2894_s3 = inlined_call_operand.hbm [shape: f32[50,50], index: 3, kind: input, shape index: {}]   ;;  %s2895_s4 = inlined_call_operand.vmem [shape: f32[4,50], index: 4, kind: input, shape index: {}]   ;;  %s2896_s5 = inlined_call_operand.hbm [shape: bf16[25,1024], index: 5, kind: input, shape index: {}]   ;;  %s2897_s6 = inlined_call_operand.vmem [shape: f32[1,1024], index: 6, kind: input, shape index: {}]   ;;  %s2898_s7 = inlined_call_operand.hbm [shape: bf16[1024,128], index: 7, kind: input, shape index: {}]   ;;  %s2899_s8 = inlined_call_operand.vmem [shape: f32[1,128], index: 8, kind: input, shape index: {}]   ;;  %s2900_s9 = inlined_call_operand.vmem [shape: bf16[128,16], index: 9, kind: input, shape index: {}]   ;;  %s2901_s10 = inlined_call_operand.vmem [shape: f32[1,16], index: 10, kind: input, shape index: {}]   ;;  %s2902_s11 = inlined_call_operand.vmem [shape: f32[1,16], index: 11, kind: input, shape index: {}]   ;;  %s2903_s12 = inlined_call_operand.<no memory space> [shape: f32[1,1], index: 12, kind: input, shape index: {}]   ;;  %s2904_s13 = inlined_call_operand.vmem [shape: f32[8,1], index: 13, kind: output, shape index: {}]  }
   0x1   :  { %v18_v0 = vstv %s2903_s12 }
   0x2   :  { %19 = vst [vmem:[#allocation2] sm:$0x1] %v18_v0 }
   0x3   :  { %20 = vsyncpa [#allocation4], 0 }
   0x4   :  { %21 = vsyncpa [#allocation6], 0  ;;  %s2422_s27 = smov [#allocation5]   ;;  %s2352_s14 = scalar_lea.hbm %s2896_s5, 2048 }
   0x5   :  { %s47_s28 = sshll.u32 %s2422_s27, 4  ;;  %p2353_p0 = scmp.ne.s32.totalorder %s2896_s5, %s2352_s14  ;;  %s48_s28 = int_to_ptr.vmem [resolvable:$true] %s47_s28 }
   0x6   :  { %p2356_p1 = scmp.lt.u32.totalorder %s2352_s14, %s2896_s5 }
   0x8   :  { %p2358_p2 = pnand %p2356_p1, %p2353_p0 }
   0xa   :  { %2361 = shalt.err (!%p2358_p2)
}
   0xb   :  { %s2362_s12 = scalar_lea.vmem %s48_s28, 2048  ;;  %p2367_p4 = scmp.lt.s32.totalorder %s48_s28, %s48_s28 }
   0xc   :  { %p2363_p3 = scmp.ne.s32.totalorder %s48_s28, %s2362_s12  ;;  %p2368_p5 = scmp.lt.s32.totalorder %s2362_s12, %s2362_s12 }
   0xe   :  { %p2369_p6 = por %p2368_p5, %p2367_p4 }
  0x10   :  { %p2370_p7 = pnand %p2369_p6, %p2363_p3 }
  0x12   :  { %2373 = shalt.err (!%p2370_p7)
}
  0x13   :  { %s2423_s19 = smov 512   ;;  %s2424_s20 = smov 32  }
  0x14   :  { %53 = dma.hbm_to_vmem [thread:$0]  %s2896_s5, 2048, %s48_s28, [#allocation6], %s2423_s19, %s2423_s19, %s2424_s20  }
  0x15   :  { %s2425_s23 = smov [#allocation3]   ;;  %s2374_s27 = scalar_lea.hbm %s2894_s3, 896 }
  0x16   :  { %s33_s24 = sshll.u32 %s2425_s23, 4  ;;  %p2375_p8 = scmp.ne.s32.totalorder %s2894_s3, %s2374_s27  ;;  %s34_s24 = int_to_ptr.vmem [resolvable:$true] %s33_s24 }
  0x17   :  { %p2378_p9 = scmp.lt.u32.totalorder %s2374_s27, %s2894_s3 }
  0x19   :  { %p2380_p10 = pnand %p2378_p9, %p2375_p8 }
  0x1b   :  { %2383 = shalt.err (!%p2380_p10)
}
  0x1c   :  { %s2384_s16 = scalar_lea.vmem %s34_s24, 896  ;;  %p2389_p12 = scmp.lt.s32.totalorder %s34_s24, %s34_s24 }
  0x1d   :  { %p2385_p11 = scmp.ne.s32.totalorder %s34_s24, %s2384_s16  ;;  %p2390_p13 = scmp.lt.s32.totalorder %s2384_s16, %s2384_s16 }
  0x1f   :  { %p2391_p0 = por %p2390_p13, %p2389_p12 }
  0x21   :  { %p2392_p1 = pnand %p2391_p0, %p2385_p11 }
  0x23   :  { %2395 = shalt.err (!%p2392_p1)
}
  0x24   :  { %s2426_s5 = smov 128   ;;  %s2427_s28 = smov 8  }
  0x25   :  { %39 = dma.hbm_to_vmem [thread:$0]  %s2894_s3, 896, %s34_s24, [#allocation4], %s2426_s5, %s2426_s5, %s2427_s28  }
  0x26   :  { %s2428_s12 = smov [#allocation7]   ;;  %s2396_s22 = scalar_lea.hbm %s2898_s7, 8192 }
  0x27   :  { %s61_s19 = sshll.u32 %s2428_s12, 4  ;;  %p2397_p2 = scmp.ne.s32.totalorder %s2898_s7, %s2396_s22  ;;  %s62_s19 = int_to_ptr.vmem [resolvable:$true] %s61_s19 }
  0x28   :  { %p2400_p3 = scmp.lt.u32.totalorder %s2396_s22, %s2898_s7 }
  0x2a   :  { %p2402_p4 = pnand %p2400_p3, %p2397_p2 }
  0x2c   :  { %2405 = shalt.err (!%p2402_p4)
}
  0x2d   :  { %s2406_s29 = scalar_lea.vmem %s62_s19, 8192  ;;  %p2411_p6 = scmp.lt.s32.totalorder %s62_s19, %s62_s19 }
  0x2e   :  { %p2407_p5 = scmp.ne.s32.totalorder %s62_s19, %s2406_s29  ;;  %p2412_p7 = scmp.lt.s32.totalorder %s2406_s29, %s2406_s29 }
  0x30   :  { %p2413_p8 = por %p2412_p7, %p2411_p6 }
  0x32   :  { %p2414_p9 = pnand %p2413_p8, %p2407_p5 }
  0x34   :  { %2417 = shalt.err (!%p2414_p9)
}
  0x35   :  { %s2429_s3 = smov 64   ;;  %s2430_s24 = smov 4  }
  0x36   :  { %67 = dma.hbm_to_vmem [thread:$0]  %s2898_s7, 8192, %s62_s19, [#allocation6], %s2429_s3, %s2429_s3, %s2430_s24  }
  0x37   :  { %2418 = dma.done.wait [#allocation4], 896  }
  0x38   :  { %2419 = vsyncadd [#allocation4], 4294966400 }
  0x39   :  { %2420 = dma.done.wait [#allocation6], 10240  }
  0x3a   :  { %2421 = vsyncadd [#allocation6], 4294957056  ;;  %vm106_vm0 = vcmask 408576   ;;  %v2549_v1 = vld [vmem:[%s2891_s0] sm:$0xff]  ;;  %v100_v3 = vld [vmem:[%s2892_s1 + $0x8] sm:$0xff]  ;;  %s2431_s12 = smov 103   ;;  %v191_v15 = vlaneseq }
  0x3b   :  { %v99_v2 = vld [vmem:[%s2892_s1] sm:$0xff]  ;;  %90 = vrot.lane.b32.xlu0 %v2549_v1, %s2431_s12  ;;  %v101_v5 = vld [vmem:[%s2892_s1 + $0x10] sm:$0xff]  ;;  %v102_v6 = vld [vmem:[%s2892_s1 + $0x18] sm:$0xff]  ;;  %2113 = vmatprep.mubr.msk.f32.mxu1 %vm106_vm0, %v2549_v1  ;;  %vm112_vm1 = vcmask 1041408   ;;  %s2432_s26 = smov 25   ;;  %vm96_vm2 = vcmask 203776  }
  0x3c   :  { %v2153_v4 = vpack.c.bf16 %v100_v3, %v99_v2  ;;  %v2157_v7 = vpack.c.bf16 %v102_v6, %v101_v5  ;;  %v103_v8 = vld [vmem:[%s2892_s1 + $0x20] sm:$0xff]  ;;  %v104_v9 = vld [vmem:[%s2892_s1 + $0x28] sm:$0xff]  ;;  %v105_v11 = vld [vmem:[%s2892_s1 + $0x30] sm:$0x3]  ;;  %v2585_v16 = vshrl.u32 %v191_v15, 7  ;;  %vm589_vm9 = vcmask 1043456  }
  0x3d   :  { %v2161_v10 = vpack.c.bf16 %v104_v9, %v103_v8  ;;  %v98_v18 = vld [vmem:[%s2893_s2] sm:$0xf]  ;;  %v283_v43 = vld [vmem:[#allocation3 + $0x8] sm:$0xff]  ;;  %v284_v44 = vld [vmem:[#allocation3 + $0x10] sm:$0xff]  ;;  %vm590_vm10 = vcmask 1044480  }
  0x3e   :  { %2154 = vmatprep.subr.bf16.mxu1 %v2153_v4  ;;  %v2588_v17 = vsub.s32 0, %v2585_v16  ;;  %v2594_v19 = vsub.s32 1, %v2585_v16  ;;  %v282_v42 = vld [vmem:[#allocation3] sm:$0xff]  ;;  %v285_v46 = vld [vmem:[#allocation3 + $0x18] sm:$0xff]  ;;  %v287_v49 = vld [vmem:[#allocation3 + $0x28] sm:$0xff]  ;;  %v2601_v57 = vsub.s32 2, %v2585_v16 }
  0x3f   :  { %2156 = vmatpush3.bf16.msra.mxu1 %v2153_v4  ;;  %93 = vrot.lane.b32.xlu0 %v2549_v1, %s2432_s26  ;;  %v2165_v45 = vpack.c.bf16 %v283_v43, %v282_v42  ;;  %v2169_v47 = vpack.c.bf16 %v285_v46, %v284_v44  ;;  %v286_v48 = vld [vmem:[#allocation3 + $0x20] sm:$0xff]  ;;  %v2604_v58 = vsub.s32 3, %v2585_v16 }
  0x40   :  { %2158 = vmatprep.subr.bf16.mxu1 %v2157_v7  ;;  %v194_v20 = vrot.slane %v98_v18, %v2588_v17  ;;  %v200_v21 = vrot.slane %v98_v18, %v2594_v19  ;;  %v2173_v50 = vpack.c.bf16 %v287_v49, %v286_v48  ;;  %v244_v59 = vrot.slane %v98_v18, %v2601_v57 }
  0x41   :  { %v250_v62 = vrot.slane %v98_v18, %v2604_v58 }
  0x43   :  { %2160 = vmatpush3.bf16.msra.mxu1 %v2157_v7 }
  0x44   :  { %2162 = vmatprep.subr.bf16.mxu1 %v2161_v10 }
  0x47   :  { %2164 = vmatpush3.bf16.msra.mxu1 %v2161_v10 }
  0x48   :  { %2111 = vmatprep.subr.msk.mxu1 %vm112_vm1, %v105_v11 }
  0x4b   :  { %2112 = vmatpush3.msk.msra.mxu1 %vm112_vm1, %v105_v11 }
  0x4c   :  { %2166 = vmatprep.subr.bf16.mxu1 %v2165_v45 }
  0xad   :  { %v91_v12 = vpop.permute.xlu0 %90 }
  0xb1   :  { %v94_v13 = vpop.permute.xlu0 %93 }
  0xb2   :  { %v2581_v14 = vsel %vm96_vm2, %v91_v12, %v94_v13 }
  0xb3   :  { %2114 = vmatmul.mubr.msk.f32.vlgmr.msra.gmra.mrb[0].mxu1 %vm106_vm0, %v2581_v14 }
  0xb4   :  { %2168 = vmatpush3.bf16.msra.mxu1 %v2165_v45 }
  0xb5   :  { %2170 = vmatprep.subr.bf16.mxu1 %v2169_v47 }
  0xb8   :  { %2172 = vmatpush3.bf16.msra.mxu1 %v2169_v47 }
  0xb9   :  { %2174 = vmatprep.subr.bf16.mxu1 %v2173_v50 }
  0xbc   :  { %2176 = vmatpush3.bf16.msra.mxu1 %v2173_v50 }
 0x186   :  { %v2115_v22 = vpop.f32.mrb[0].mxu1 }
 0x187   :  { %v196_v23 = vmul.f32 %v2115_v22, %v194_v20  ;;  %v182_v24 = vpop.f32.mrb[1].mxu1  ;;  %v288_v22 = vld [vmem:[#allocation3 + $0x30] sm:$0x3] }
 0x188   :  { %v195_v25 = vmul.f32 %v194_v20, %v182_v24  ;;  %2128 = vmatprep.subr.msk.mxu1 %vm112_vm1, %v288_v22 }
 0x189   :  { %v202_v26 = vadd.f32 %v200_v21, %v196_v23  ;;  %2129 = vmatpush3.msk.msra.mxu1 %vm112_vm1, %v288_v22  ;;  %v2655_v22 = vld [vmem:[#allocation5 + $0x30] sm:$0xff] }
 0x18a   :  { %v201_v27 = vadd.f32 %v200_v21, %v195_v25 }
 0x18b   :  { %v218_v28 = vmin.f32 %v202_v26, 20.0  ;;  %vm216_vm3 = vcmp.gt.f32.partialorder %v202_v26, 20.0  ;;  %v1882_v51 = vmul.f32 -1.442695, %v202_v26 }
 0x18c   :  { %v217_v29 = vmin.f32 %v201_v27, 20.0  ;;  %vm215_vm4 = vcmp.gt.f32.partialorder %v201_v27, 20.0  ;;  %v1881_v52 = vmul.f32 -1.442695, %v201_v27 }
 0x18d   :  { %v221_v30 = vmul.f32 1.442695, %v218_v28 }
 0x18e   :  { %v219_v31 = vmul.f32 1.442695, %v217_v29 }
 0x18f   :  { %2264 = vpow2.f32 %v221_v30 }
 0x190   :  { %2266 = vpow2.f32 %v219_v31  ;;  %v2627_v31 = vld [vmem:[%s2895_s4] sm:$0xf] }
 0x199   :  { %v2265_v32 = vpop.eup %2264 }
 0x19a   :  { %v2267_v33 = vpop.eup %2266  ;;  %v224_v34 = vadd.f32 1.0, %v2265_v32  ;;  %v376_v32 = vrot.slane %v2627_v31, %v2588_v17 }
 0x19b   :  { %v223_v35 = vadd.f32 1.0, %v2267_v33  ;;  %v382_v33 = vrot.slane %v2627_v31, %v2594_v19 }
 0x19c   :  { %2268 = vlog2.f32 %v224_v34 }
 0x19d   :  { %2270 = vlog2.f32 %v223_v35 }
 0x19e   :  { %2272 = vpow2.f32 %v1882_v51 }
 0x19f   :  { %2274 = vpow2.f32 %v1881_v52 }
 0x1a6   :  { %v2269_v36 = vpop.eup %2268 }
 0x1a7   :  { %v2271_v37 = vpop.eup %2270  ;;  %v228_v38 = vmul.f32 0.6931472, %v2269_v36 }
 0x1a8   :  { %v226_v40 = vmul.f32 0.6931472, %v2271_v37  ;;  %v2273_v53 = vpop.eup %2272 }
 0x1a9   :  { %v230_v39 = vsel %vm216_vm3, %v202_v26, %v228_v38  ;;  %v210_v54 = vadd.f32 1.0, %v2273_v53  ;;  %v2275_v55 = vpop.eup %2274 }
 0x1aa   :  { %235 = vrot.lane.b32.xlu1 %v230_v39, %s2431_s12  ;;  %v229_v41 = vsel %vm215_vm4, %v201_v27, %v226_v40  ;;  %v209_v56 = vadd.f32 1.0, %v2275_v55  ;;  %v460_v55 = vld [vmem:[#allocation5 + $0x20] sm:$0xff] }
 0x1ab   :  { %2276 = vrcp.f32 %v210_v54  ;;  %v456_v54 = vld [vmem:[#allocation5] sm:$0xff] }
 0x1ac   :  { %2278 = vrcp.f32 %v209_v56  ;;  %v457_v56 = vld [vmem:[#allocation5 + $0x8] sm:$0xff] }
 0x1ae   :  { %233 = vrot.lane.b32.xlu1 %v229_v41, %s2431_s12 }
 0x1b5   :  { %v2277_v60 = vpop.eup %2276 }
 0x1b6   :  { %v2279_v2 = vpop.eup %2278 }
 0x21c   :  { %v236_v61 = vpop.permute.xlu1 %235 }
 0x21d   :  { %v240_v63 = vmul.f32 %v2277_v60, %v236_v61  ;;  %v461_v60 = vld [vmem:[#allocation5 + $0x28] sm:$0xff]  ;;  %v1888_v61 = vcombine.low %v456_v54, %v460_v55 }
 0x21f   :  { %v246_v0 = vmul.f32 %v244_v59, %v240_v63  ;;  %v468_v63 = vld [vmem:[#allocation5 + $0x60] sm:$0x11] }
 0x220   :  { %v234_v3 = vpop.permute.xlu1 %233 }
 0x221   :  { %v252_v4 = vadd.f32 %v250_v62, %v246_v0  ;;  %v239_v5 = vmul.f32 %v2279_v2, %v234_v3  ;;  %v2433_v0 = vmov 65535   ;;  %v1890_v3 = vcombine.low %v457_v56, %v461_v60 }
 0x222   :  { %v591_v2 = vsel %vm589_vm9, 4294967295, %v2433_v0  ;;  %v471_v0 = vld [vmem:[#allocation5 + $0x78] sm:$0x11]  ;;  %vm1870_vm9 = vcmask 7168  }
 0x223   :  { %v245_v6 = vmul.f32 %v244_v59, %v239_v5  ;;  %v254_v7 = vadd.f32 %v252_v4, %v2581_v14  ;;  %v1889_v59 = vcombine.high %v456_v54, %v460_v55  ;;  %v1891_v4 = vcombine.high %v457_v56, %v461_v60 }
 0x225   :  { %v251_v8 = vadd.f32 %v250_v62, %v245_v6  ;;  %v258_v9 = vmin.f32 %v254_v7, 20.0  ;;  %vm256_vm5 = vcmp.gt.f32.partialorder %v254_v7, 20.0  ;;  %v464_v62 = vld [vmem:[#allocation5 + $0x40] sm:$0xff]  ;;  %v2645_v6 = vsel %vm590_vm10, %v591_v2, 0  ;;  %617 = vmatprep.subr.bf16.mxu0 %v1889_v59  ;;  %658 = vmatprep.subr.bf16.mxu1 %v1891_v4 }
 0x226   :  { %v1897_v5 = vcombine.high %v464_v62, %v468_v63  ;;  %618 = vmatpush1.bf16.msra.mxu0 %v1888_v61 }
 0x227   :  { %v261_v10 = vmul.f32 1.442695, %v258_v9  ;;  %v253_v11 = vadd.f32 %v251_v8, %v2549_v1  ;;  %v469_v8 = vld [vmem:[#allocation5 + $0x68] sm:$0x11]  ;;  %v2434_v9 = vmov 0  }
 0x228   :  { %649 = vmatprep.mubr.bf16.mxu0 %v2434_v9 }
 0x229   :  { %2280 = vpow2.f32 %v261_v10  ;;  %v257_v12 = vmin.f32 %v253_v11, 20.0  ;;  %vm255_vm6 = vcmp.gt.f32.partialorder %v253_v11, 20.0 }
 0x22b   :  { %v259_v13 = vmul.f32 1.442695, %v257_v12  ;;  %v1896_v12 = vcombine.low %v464_v62, %v468_v63  ;;  %v466_v62 = vld [vmem:[#allocation5 + $0x50] sm:$0xff] }
 0x22c   :  { %v470_v63 = vld [vmem:[#allocation5 + $0x70] sm:$0x11] }
 0x22d   :  { %2282 = vpow2.f32 %v259_v13  ;;  %v597_v13 = vand.u32 %v1897_v5, %v2645_v6  ;;  %v1901_v5 = vcombine.high %v466_v62, %v470_v63 }
 0x22f   :  { %619 = vmatprep.subr.bf16.mxu0 %v597_v13  ;;  %v609_v13 = vand.u32 %v1901_v5, %v2645_v6 }
 0x233   :  { %v2281_v15 = vpop.eup %2280 }
 0x234   :  { %v264_v18 = vadd.f32 1.0, %v2281_v15 }
 0x236   :  { %2284 = vlog2.f32 %v264_v18  ;;  %v594_v18 = vand.u32 %v1896_v12, %v2645_v6 }
 0x237   :  { %v2283_v20 = vpop.eup %2282 }
 0x238   :  { %v263_v21 = vadd.f32 1.0, %v2283_v20  ;;  %620 = vmatpush1.bf16.msra.mxu0 %v594_v18 }
 0x23a   :  { %2286 = vlog2.f32 %v263_v21  ;;  %v2653_v21 = vld [vmem:[#allocation5 + $0x10] sm:$0xff] }
 0x240   :  { %v2285_v14 = vpop.eup %2284 }
 0x241   :  { %v268_v23 = vmul.f32 0.6931472, %v2285_v14  ;;  %v2657_v14 = vld [vmem:[#allocation5 + $0x18] sm:$0xff] }
 0x243   :  { %v270_v24 = vsel %vm256_vm5, %v254_v7, %v268_v23  ;;  %v465_v7 = vld [vmem:[#allocation5 + $0x48] sm:$0xff]  ;;  %v1893_v23 = vcombine.high %v2653_v21, %v2655_v22  ;;  %vm2436_vm5 = vmmov 0  }
 0x244   :  { %v2287_v1 = vpop.eup %2286  ;;  %273 = vrot.lane.b32.xlu0 %v270_v24, %s2432_s26  ;;  %v1898_v10 = vcombine.low %v465_v7, %v469_v8 }
 0x245   :  { %v266_v25 = vmul.f32 0.6931472, %v2287_v1  ;;  %v1892_v1 = vcombine.low %v2653_v21, %v2655_v22  ;;  %699 = vmatprep.subr.bf16.mxu0 %v1893_v23  ;;  %v2192_v21 = vld [vmem:[#allocation7 + $0x40] sm:$0xff]  }
 0x246   :  { %v600_v20 = vand.u32 %v1898_v10, %v2645_v6  ;;  %v1900_v10 = vcombine.low %v466_v62, %v470_v63  ;;  %v2193_v22 = vld [vmem:[#allocation7 + $0xc0] sm:$0xff]  }
 0x247   :  { %v269_v26 = vsel %vm255_vm6, %v253_v11, %v266_v25  ;;  %v1899_v11 = vcombine.high %v465_v7, %v469_v8  ;;  %v2195_v23 = vld [vmem:[#allocation7 + $0x80] sm:$0xff]  }
 0x248   :  { %275 = vrot.lane.b32.xlu1 %v269_v26, %s2432_s26  ;;  %v606_v18 = vand.u32 %v1900_v10, %v2645_v6 }
 0x249   :  { %v603_v15 = vand.u32 %v1899_v11, %v2645_v6 }
 0x2b6   :  { %v274_v27 = vpop.permute.xlu0 %273 }
 0x2b7   :  { %v2615_v28 = vsel %vm96_vm2, %v269_v26, %v274_v27 }
 0x2b8   :  { %2130 = vmatprep.mubr.msk.f32.mxu1 %vm106_vm0, %v2615_v28 }
 0x2ba   :  { %v276_v29 = vpop.permute.xlu1 %275 }
 0x2bb   :  { %v2620_v30 = vsel %vm96_vm2, %v270_v24, %v276_v29  ;;  %v2661_v24 = vld [vmem:[#allocation5 + $0x38] sm:$0xff] }
 0x2bc   :  { %2131 = vmatmul.mubr.msk.f32.vlgmr.msra.gmra.mrb[2].mxu1 %vm106_vm0, %v2620_v30  ;;  %v1894_v25 = vcombine.low %v2657_v14, %v2661_v24  ;;  %v1895_v26 = vcombine.high %v2657_v14, %v2661_v24  ;;  %v2194_v14 = vld [vmem:[#allocation7] sm:$0xff]   ;;  %v2197_v24 = vld [vmem:[#allocation7 + $0xc8] sm:$0xff]  }
 0x2bd   :  { %690 = vmatprep.mubr.bf16.mxu1 %v2434_v9  ;;  %659 = vmatpush1.bf16.msra.mxu1 %v1890_v3 }
 0x2be   :  { %660 = vmatprep.subr.bf16.mxu1 %v603_v15 }
 0x2c1   :  { %661 = vmatpush1.bf16.msra.mxu1 %v600_v20 }
 0x2c2   :  { %740 = vmatprep.subr.bf16.mxu1 %v1895_v26  ;;  %v2201_v26 = vld [vmem:[#allocation7 + $0xd0] sm:$0xff]  }
 0x38f   :  { %v2132_v34 = vpop.f32.mrb[2].mxu1 }
 0x390   :  { %v378_v35 = vmul.f32 %v2132_v34, %v376_v32  ;;  %v364_v36 = vpop.f32.mrb[3].mxu1 }
 0x391   :  { %v377_v37 = vmul.f32 %v376_v32, %v364_v36  ;;  %v426_v36 = vrot.slane %v2627_v31, %v2601_v57 }
 0x392   :  { %v2633_v38 = vadd.f32 %v382_v33, %v378_v35 }
 0x393   :  { %v2635_v39 = vadd.f32 %v382_v33, %v377_v37 }
 0x394   :  { %v400_v40 = vmin.f32 %v2633_v38, 20.0  ;;  %vm398_vm7 = vcmp.gt.f32.partialorder %v2633_v38, 20.0  ;;  %v1887_v27 = vmul.f32 -1.442695, %v2633_v38 }
 0x395   :  { %v399_v41 = vmin.f32 %v2635_v39, 20.0  ;;  %vm397_vm8 = vcmp.gt.f32.partialorder %v2635_v39, 20.0  ;;  %v1886_v29 = vmul.f32 -1.442695, %v2635_v39 }
 0x396   :  { %v403_v42 = vmul.f32 1.442695, %v400_v40 }
 0x397   :  { %v401_v43 = vmul.f32 1.442695, %v399_v41 }
 0x398   :  { %2288 = vpow2.f32 %v403_v42  ;;  %v432_v42 = vrot.slane %v2627_v31, %v2604_v58 }
 0x399   :  { %2290 = vpow2.f32 %v401_v43 }
 0x3a2   :  { %v2289_v44 = vpop.eup %2288 }
 0x3a3   :  { %v2291_v45 = vpop.eup %2290  ;;  %v406_v46 = vadd.f32 1.0, %v2289_v44 }
 0x3a4   :  { %v405_v47 = vadd.f32 1.0, %v2291_v45 }
 0x3a5   :  { %2292 = vlog2.f32 %v406_v46 }
 0x3a6   :  { %2294 = vlog2.f32 %v405_v47 }
 0x3a7   :  { %2296 = vpow2.f32 %v1887_v27  ;;  %v2202_v27 = vld [vmem:[#allocation7 + $0x10] sm:$0xff]  }
 0x3a8   :  { %2298 = vpow2.f32 %v1886_v29  ;;  %v2203_v29 = vld [vmem:[#allocation7 + $0x90] sm:$0xff]  }
 0x3af   :  { %v2293_v48 = vpop.eup %2292 }
 0x3b0   :  { %v2295_v49 = vpop.eup %2294  ;;  %v410_v50 = vmul.f32 0.6931472, %v2293_v48 }
 0x3b1   :  { %v408_v51 = vmul.f32 0.6931472, %v2295_v49  ;;  %v2297_v32 = vpop.eup %2296 }
 0x3b2   :  { %v412_v52 = vsel %vm398_vm7, %v2633_v38, %v410_v50  ;;  %v2299_v33 = vpop.eup %2298  ;;  %v392_v34 = vadd.f32 1.0, %v2297_v32  ;;  %v2204_v32 = vld [vmem:[#allocation7 + $0x58] sm:$0xff]  }
 0x3b3   :  { %417 = vrot.lane.b32.xlu1 %v412_v52, %s2431_s12  ;;  %v411_v53 = vsel %vm397_vm8, %v2635_v39, %v408_v51  ;;  %v391_v35 = vadd.f32 1.0, %v2299_v33  ;;  %v2205_v33 = vld [vmem:[#allocation7 + $0xd8] sm:$0xff]   ;;  %vm1858_vm8 = vcmask 130048  }
 0x3b4   :  { %415 = vrot.lane.b32.xlu0 %v411_v53, %s2431_s12  ;;  %2300 = vrcp.f32 %v392_v34  ;;  %v2206_v34 = vld [vmem:[#allocation7 + $0x18] sm:$0xff]  }
 0x3b5   :  { %2302 = vrcp.f32 %v391_v35  ;;  %v2207_v35 = vld [vmem:[#allocation7 + $0x98] sm:$0xff]  }
 0x3be   :  { %v2301_v37 = vpop.eup %2300 }
 0x3bf   :  { %v2303_v41 = vpop.eup %2302 }
 0x425   :  { %v418_v40 = vpop.permute.xlu1 %417 }
 0x426   :  { %v422_v38 = vmul.f32 %v2301_v37, %v418_v40  ;;  %v416_v43 = vpop.permute.xlu0 %415  ;;  %v2209_v37 = vld [vmem:[#allocation7 + $0xe0] sm:$0xff]  }
 0x427   :  { %v421_v39 = vmul.f32 %v2303_v41, %v416_v43  ;;  %v2210_v40 = vld [vmem:[#allocation7 + $0x20] sm:$0xff]   ;;  %v2214_v43 = vld [vmem:[#allocation7 + $0x28] sm:$0xff]  }
 0x428   :  { %v428_v44 = vmul.f32 %v426_v36, %v422_v38  ;;  %v2211_v41 = vld [vmem:[#allocation7 + $0xa0] sm:$0xff]   ;;  %v2213_v38 = vld [vmem:[#allocation7 + $0xe8] sm:$0xff]  }
 0x429   :  { %v427_v45 = vmul.f32 %v426_v36, %v421_v39  ;;  %v2208_v36 = vld [vmem:[#allocation7 + $0x60] sm:$0xff]   ;;  %v2215_v39 = vld [vmem:[#allocation7 + $0xa8] sm:$0xff]  }
 0x42a   :  { %v434_v46 = vadd.f32 %v432_v42, %v428_v44  ;;  %v2216_v44 = vld [vmem:[#allocation7 + $0x70] sm:$0xff]  }
 0x42b   :  { %v433_v47 = vadd.f32 %v432_v42, %v427_v45  ;;  %v2212_v42 = vld [vmem:[#allocation7 + $0x68] sm:$0xff]   ;;  %v2217_v45 = vld [vmem:[#allocation7 + $0xf0] sm:$0xff]  }
 0x42c   :  { %v436_v48 = vadd.f32 %v434_v46, %v2620_v30  ;;  %v2218_v46 = vld [vmem:[#allocation7 + $0x30] sm:$0xff]  }
 0x42d   :  { %v435_v49 = vadd.f32 %v433_v47, %v2615_v28  ;;  %v467_v28 = vld [vmem:[#allocation5 + $0x58] sm:$0xff]  ;;  %v2219_v47 = vld [vmem:[#allocation7 + $0xb0] sm:$0xff]  }
 0x42e   :  { %v440_v50 = vmin.f32 %v436_v48, 20.0  ;;  %vm438_vm11 = vcmp.gt.f32.partialorder %v436_v48, 20.0  ;;  %v1903_v7 = vcombine.high %v467_v28, %v471_v0  ;;  %v1902_v11 = vcombine.low %v467_v28, %v471_v0 }
 0x42f   :  { %v439_v51 = vmin.f32 %v435_v49, 20.0  ;;  %vm437_vm12 = vcmp.gt.f32.partialorder %v435_v49, 20.0 }
 0x430   :  { %v443_v52 = vmul.f32 1.442695, %v440_v50  ;;  %v615_v15 = vand.u32 %v1903_v7, %v2645_v6  ;;  %v612_v20 = vand.u32 %v1902_v11, %v2645_v6  ;;  %v2196_v6 = vld [vmem:[#allocation7 + $0x48] sm:$0xff]   ;;  %v2222_v50 = vld [vmem:[#allocation7 + $0x38] sm:$0xff]   ;;  %v500_v7 = vsub.s32 6, %v2585_v16 }
 0x431   :  { %v441_v53 = vmul.f32 1.442695, %v439_v51  ;;  %v2223_v51 = vld [vmem:[#allocation7 + $0xb8] sm:$0xff]   ;;  %v496_v11 = vsub.s32 5, %v2585_v16 }
 0x432   :  { %2304 = vpow2.f32 %v443_v52  ;;  %v2224_v52 = vld [vmem:[#allocation7 + $0x140] sm:$0xff]  }
 0x433   :  { %2306 = vpow2.f32 %v441_v53  ;;  %v2225_v53 = vld [vmem:[#allocation7 + $0x1c0] sm:$0xff]  }
 0x43c   :  { %v2305_v54 = vpop.eup %2304 }
 0x43d   :  { %v2307_v55 = vpop.eup %2306  ;;  %v446_v31 = vadd.f32 1.0, %v2305_v54  ;;  %v472_v54 = vld [vmem:[%s2897_s6] sm:$0xff] }
 0x43e   :  { %v445_v56 = vadd.f32 1.0, %v2307_v55  ;;  %v477_v55 = vrot.slane %v472_v54, %v2588_v17 }
 0x43f   :  { %2308 = vlog2.f32 %v446_v31  ;;  %v485_v31 = vrot.slane %v472_v54, %v2601_v57 }
 0x440   :  { %2310 = vlog2.f32 %v445_v56  ;;  %v481_v56 = vrot.slane %v472_v54, %v2594_v19 }
 0x449   :  { %v2309_v59 = vpop.eup %2308 }
 0x44a   :  { %v2311_v60 = vpop.eup %2310  ;;  %v450_v61 = vmul.f32 0.6931472, %v2309_v59  ;;  %v489_v59 = vrot.slane %v472_v54, %v2604_v58  ;;  %v492_v58 = vsub.s32 4, %v2585_v16 }
 0x44b   :  { %v448_v30 = vmul.f32 0.6931472, %v2311_v60 }
 0x44c   :  { %v452_v2 = vsel %vm438_vm11, %v436_v48, %v450_v61  ;;  %v2220_v48 = vld [vmem:[#allocation7 + $0x78] sm:$0xff]  }
 0x44d   :  { %v451_v3 = vsel %vm437_vm12, %v435_v49, %v448_v30  ;;  %v2221_v49 = vld [vmem:[#allocation7 + $0xf8] sm:$0xff]  }
 0x44e   :  { %v453_v4 = vadd.f32 %v452_v2, %v451_v3 }
 0x450   :  { %v454_v8 = vmul.f32 0.5, %v453_v4 }
 0x452   :  { %v455_v12 = vpack.c.bf16 %v454_v8, %v454_v8 }
 0x454   :  { %1904 = vmatmul.mubr.msk.bf16.vlgmr.msra.gmra.mrb[0].mxu0 %vm96_vm2, %v455_v12  ;;  %1905 = vmatmul.mubr.msk.bf16.vlgmr.msra.gmra.mrb[4].mxu1 %vm96_vm2, %v455_v12 }
 0x455   :  { %700 = vmatpush1.bf16.msra.mxu0 %v1892_v1  ;;  %741 = vmatpush1.bf16.msra.mxu1 %v1894_v25  ;;  %v2198_v1 = vld [vmem:[#allocation7 + $0x8] sm:$0xff]  }
 0x456   :  { %701 = vmatprep.subr.bf16.mxu0 %v609_v13  ;;  %742 = vmatprep.subr.bf16.mxu1 %v615_v15  ;;  %v2199_v25 = vld [vmem:[#allocation7 + $0x88] sm:$0xff]  }
 0x457   :  { %731 = vmatprep.mubr.bf16.mxu0 %v2434_v9  ;;  %772 = vmatprep.mubr.bf16.mxu1 %v2434_v9  ;;  %v2200_v9 = vld [vmem:[#allocation7 + $0x50] sm:$0xff]  }
 0x459   :  { %702 = vmatpush1.bf16.msra.mxu0 %v606_v18  ;;  %743 = vmatpush1.bf16.msra.mxu1 %v612_v20  ;;  %v493_v20 = vrot.slane %v472_v54, %v492_v58 }
 0x45a   :  { %2002 = vmatprep.subr.bf16.mxu0 %v2192_v21  ;;  %2024 = vmatprep.subr.bf16.mxu1 %v2193_v22  ;;  %v504_v21 = vsub.s32 7, %v2585_v16 }
 0x45c   :  { %1906 = vmatmul.mubr.msk.bf16.vlgmr.msra.gmra.mrb[4].mxu0 %vm96_vm2, %v455_v12  ;;  %1907 = vmatmul.mubr.msk.bf16.vlgmr.msra.gmra.mrb[8].mxu1 %vm96_vm2, %v455_v12 }
 0x45d   :  { %2003 = vmatpush3.bf16.msra.mxu0 %v2194_v14  ;;  %2025 = vmatpush3.bf16.msra.mxu1 %v2195_v23  ;;  %v501_v14 = vrot.slane %v472_v54, %v500_v7 }
 0x45e   :  { %2004 = vmatprep.subr.bf16.mxu0 %v2196_v6  ;;  %2026 = vmatprep.subr.bf16.mxu1 %v2197_v24 }
 0x461   :  { %2005 = vmatpush3.bf16.msra.mxu0 %v2198_v1  ;;  %2027 = vmatpush3.bf16.msra.mxu1 %v2199_v25 }
 0x462   :  { %2006 = vmatprep.subr.bf16.mxu0 %v2200_v9  ;;  %2028 = vmatprep.subr.bf16.mxu1 %v2201_v26  ;;  %v497_v9 = vrot.slane %v472_v54, %v496_v11 }
 0x465   :  { %2007 = vmatpush3.bf16.msra.mxu0 %v2202_v27  ;;  %2029 = vmatpush3.bf16.msra.mxu1 %v2203_v29 }
 0x466   :  { %2008 = vmatprep.subr.bf16.mxu0 %v2204_v32  ;;  %2030 = vmatprep.subr.bf16.mxu1 %v2205_v33 }
 0x469   :  { %2009 = vmatpush3.bf16.msra.mxu0 %v2206_v34  ;;  %2031 = vmatpush3.bf16.msra.mxu1 %v2207_v35  ;;  %v505_v34 = vrot.slane %v472_v54, %v504_v21 }
 0x46a   :  { %2010 = vmatprep.subr.bf16.mxu0 %v2208_v36  ;;  %2032 = vmatprep.subr.bf16.mxu1 %v2209_v37 }
 0x46d   :  { %2011 = vmatpush3.bf16.msra.mxu0 %v2210_v40  ;;  %2033 = vmatpush3.bf16.msra.mxu1 %v2211_v41 }
 0x46e   :  { %2012 = vmatprep.subr.bf16.mxu0 %v2212_v42  ;;  %2034 = vmatprep.subr.bf16.mxu1 %v2213_v38 }
 0x471   :  { %2013 = vmatpush3.bf16.msra.mxu0 %v2214_v43  ;;  %2035 = vmatpush3.bf16.msra.mxu1 %v2215_v39 }
 0x472   :  { %2014 = vmatprep.subr.bf16.mxu0 %v2216_v44  ;;  %2036 = vmatprep.subr.bf16.mxu1 %v2217_v45 }
 0x475   :  { %2015 = vmatpush3.bf16.msra.mxu0 %v2218_v46  ;;  %2037 = vmatpush3.bf16.msra.mxu1 %v2219_v47 }
 0x476   :  { %2016 = vmatprep.subr.bf16.mxu0 %v2220_v48  ;;  %2038 = vmatprep.subr.bf16.mxu1 %v2221_v49 }
 0x479   :  { %2017 = vmatpush3.bf16.msra.mxu0 %v2222_v50  ;;  %2039 = vmatpush3.bf16.msra.mxu1 %v2223_v51 }
 0x47a   :  { %2046 = vmatprep.subr.bf16.mxu0 %v2224_v52  ;;  %2068 = vmatprep.subr.bf16.mxu1 %v2225_v53 }
 0x527   :  { %v651_v60 = vpop.f32.mrb[0].mxu0  ;;  %v692_v61 = vpop.f32.mrb[4].mxu1 }
 0x528   :  { %v2700_v62 = vadd.f32 %v651_v60, %v477_v55  ;;  %v2702_v63 = vadd.f32 %v692_v61, %v485_v31  ;;  %v653_v30 = vpop.f32.mrb[1].mxu0  ;;  %v694_v28 = vpop.f32.mrb[5].mxu1 }
 0x529   :  { %v2704_v0 = vadd.f32 %v653_v30, %v481_v56  ;;  %v2706_v2 = vadd.f32 %v694_v28, %v489_v59  ;;  %v655_v3 = vpop.f32.mrb[2].mxu0  ;;  %v696_v17 = vpop.f32.mrb[6].mxu1 }
 0x52a   :  { %v2709_v57 = vmul.f32 0.70710677, %v2700_v62  ;;  %v2712_v19 = vmul.f32 0.70710677, %v2702_v63  ;;  %v656_v1 = vpop.f32.mrb[3].mxu0  ;;  %v697_v25 = vpop.f32.mrb[7].mxu1 }
 0x52b   :  { %v2716_v4 = vmul.f32 0.70710677, %v2704_v0  ;;  %v2719_v5 = vmul.f32 0.70710677, %v2706_v2 }
 0x52c   :  { %v797_v8 = vand.u32 2147483647, %v2709_v57  ;;  %v799_v10 = vand.u32 2147483647, %v2712_v19  ;;  %vm957_vm13 = vcmp.lt.f32.partialorder %v2709_v57, 0.0  ;;  %vm959_vm14 = vcmp.lt.f32.partialorder %v2712_v19, 0.0 }
 0x52d   :  { %v798_v12 = vand.u32 2147483647, %v2716_v4  ;;  %v2727_v13 = vand.u32 2147483647, %v2719_v5  ;;  %vm958_vm15 = vcmp.lt.f32.partialorder %v2716_v4, 0.0  ;;  %vm960_vm0 = vcmp.lt.f32.partialorder %v2719_v5, 0.0 }
 0x52e   :  { %v805_v15 = vmul.f32 0.3275911, %v797_v8  ;;  %v807_v18 = vmul.f32 0.3275911, %v799_v10  ;;  %v909_v48 = vsub.f32 0.0, %v797_v8  ;;  %v911_v50 = vsub.f32 0.0, %v799_v10 }
 0x52f   :  { %v806_v22 = vmul.f32 0.3275911, %v798_v12  ;;  %v808_v24 = vmul.f32 0.3275911, %v2727_v13  ;;  %v733_v26 = vpop.f32.mrb[4].mxu0  ;;  %v774_v27 = vpop.f32.mrb[8].mxu1 }
 0x530   :  { %v813_v23 = vadd.f32 1.0, %v805_v15  ;;  %v815_v6 = vadd.f32 1.0, %v807_v18  ;;  %v2731_v32 = vadd.f32 %v733_v26, %v493_v20  ;;  %v735_v33 = vpop.f32.mrb[5].mxu0  ;;  %v776_v35 = vpop.f32.mrb[9].mxu1  ;;  %v2733_v16 = vadd.f32 %v774_v27, %v501_v14 }
 0x531   :  { %v814_v29 = vadd.f32 1.0, %v806_v22  ;;  %v737_v36 = vpop.f32.mrb[6].mxu0  ;;  %v778_v37 = vpop.f32.mrb[10].mxu1  ;;  %v816_v40 = vadd.f32 1.0, %v808_v24  ;;  %v2738_v42 = vadd.f32 %v735_v33, %v497_v9  ;;  %v2746_v45 = vadd.f32 %v776_v35, %v505_v34 }
 0x532   :  { %2312 = vrcp.f32 %v813_v23  ;;  %v2736_v41 = vmul.f32 0.70710677, %v2731_v32  ;;  %v738_v38 = vpop.f32.mrb[7].mxu0  ;;  %v779_v43 = vpop.f32.mrb[11].mxu1  ;;  %v2741_v39 = vmul.f32 0.70710677, %v2733_v16  ;;  %v917_v60 = vmul.f32 %v909_v48, %v797_v8 }
 0x533   :  { %2314 = vrcp.f32 %v815_v6  ;;  %v2752_v47 = vmul.f32 0.70710677, %v2738_v42  ;;  %v2758_v54 = vmul.f32 0.70710677, %v2746_v45  ;;  %v910_v55 = vsub.f32 0.0, %v798_v12 }
 0x534   :  { %2316 = vrcp.f32 %v814_v29  ;;  %v2744_v44 = vand.u32 2147483647, %v2736_v41  ;;  %v2749_v46 = vand.u32 2147483647, %v2741_v39  ;;  %v919_v3 = vmul.f32 %v911_v50, %v799_v10 }
 0x535   :  { %2318 = vrcp.f32 %v816_v40  ;;  %v802_v52 = vand.u32 2147483647, %v2752_v47  ;;  %v2763_v61 = vand.u32 2147483647, %v2758_v54  ;;  %v912_v7 = vsub.f32 0.0, %v2727_v13 }
 0x536   :  { %v809_v49 = vmul.f32 0.3275911, %v2744_v44  ;;  %v811_v51 = vmul.f32 0.3275911, %v2749_v46  ;;  %v918_v18 = vmul.f32 %v910_v55, %v798_v12  ;;  %v925_v20 = vmul.f32 1.442695, %v917_v60 }
 0x537   :  { %v810_v56 = vmul.f32 0.3275911, %v802_v52  ;;  %v812_v11 = vmul.f32 0.3275911, %v2763_v61  ;;  %v929_v23 = vmul.f32 1.442695, %v919_v3  ;;  %v920_v12 = vmul.f32 %v912_v7, %v2727_v13 }
 0x538   :  { %v817_v53 = vadd.f32 1.0, %v809_v49  ;;  %v819_v31 = vadd.f32 1.0, %v811_v51  ;;  %v2778_v24 = vmul.f32 0.5, %v2700_v62  ;;  %v927_v9 = vmul.f32 1.442695, %v918_v18 }
 0x539   :  { %v818_v17 = vadd.f32 1.0, %v810_v56  ;;  %v820_v22 = vadd.f32 1.0, %v812_v11  ;;  %v914_v29 = vsub.f32 0.0, %v802_v52  ;;  %v2785_v35 = vmul.f32 0.5, %v2702_v63 }
 0x53a   :  { %2320 = vrcp.f32 %v817_v53  ;;  %v2792_v37 = vmul.f32 0.5, %v2704_v0  ;;  %v931_v40 = vmul.f32 1.442695, %v920_v12  ;;  %v913_v0 = vsub.f32 0.0, %v2744_v44 }
 0x53b   :  { %2322 = vrcp.f32 %v819_v31  ;;  %v922_v53 = vmul.f32 %v914_v29, %v802_v52  ;;  %vm962_vm1 = vcmp.lt.f32.partialorder %v2752_v47, 0.0  ;;  %vm964_vm2 = vcmp.lt.f32.partialorder %v2758_v54, 0.0 }
 0x53c   :  { %v2760_v59 = vpop.eup %2312  ;;  %2324 = vrcp.f32 %v818_v17  ;;  %vm961_vm3 = vcmp.lt.f32.partialorder %v2736_v41, 0.0  ;;  %vm963_vm4 = vcmp.lt.f32.partialorder %v2741_v39, 0.0  ;;  %v787_v39 = vmul.f32 0.5, %v2733_v16  ;;  %v2257_v16 = vld [vmem:[%s2900_s9 + $0x8] sm:$0xff]  }
 0x53d   :  { %v2765_v30 = vpop.eup %2314  ;;  %v837_v28 = vmul.f32 1.0614054, %v2760_v59  ;;  %2326 = vrcp.f32 %v820_v22 }
 0x53e   :  { %v839_v58 = vmul.f32 1.0614054, %v2765_v30  ;;  %v2771_v8 = vpop.eup %2316  ;;  %2328 = vpow2.f32 %v925_v20  ;;  %v915_v20 = vsub.f32 0.0, %v2749_v46 }
 0x53f   :  { %v845_v15 = vadd.f32 -1.4531521, %v837_v28  ;;  %v838_v10 = vmul.f32 1.0614054, %v2771_v8  ;;  %v2775_v6 = vpop.eup %2318  ;;  %2330 = vpow2.f32 %v929_v23 }
 0x540   :  { %v847_v21 = vadd.f32 -1.4531521, %v839_v58  ;;  %v840_v33 = vmul.f32 1.0614054, %v2775_v6  ;;  %2332 = vpow2.f32 %v927_v9  ;;  %v916_v58 = vsub.f32 0.0, %v2763_v61 }
 0x541   :  { %v853_v14 = vmul.f32 %v2760_v59, %v845_v15  ;;  %v846_v26 = vadd.f32 -1.4531521, %v838_v10  ;;  %2334 = vpow2.f32 %v931_v40 }
 0x542   :  { %v855_v1 = vmul.f32 %v2765_v30, %v847_v21  ;;  %v848_v38 = vadd.f32 -1.4531521, %v840_v33  ;;  %v935_v21 = vmul.f32 1.442695, %v922_v53 }
 0x543   :  { %v861_v25 = vadd.f32 1.4214138, %v853_v14  ;;  %v854_v62 = vmul.f32 %v2771_v8, %v846_v26 }
 0x544   :  { %v863_v27 = vadd.f32 1.4214138, %v855_v1  ;;  %v2788_v36 = vpop.eup %2320  ;;  %v856_v55 = vmul.f32 %v2775_v6, %v848_v38  ;;  %2336 = vpow2.f32 %v935_v21 }
 0x545   :  { %v869_v34 = vmul.f32 %v2760_v59, %v861_v25  ;;  %v2794_v43 = vpop.eup %2322  ;;  %v841_v49 = vmul.f32 1.0614054, %v2788_v36  ;;  %v862_v63 = vadd.f32 1.4214138, %v854_v62  ;;  %v924_v62 = vmul.f32 %v916_v58, %v2763_v61 }
 0x546   :  { %v871_v13 = vmul.f32 %v2765_v30, %v863_v27  ;;  %v843_v51 = vmul.f32 1.0614054, %v2794_v43  ;;  %v2802_v28 = vpop.eup %2324  ;;  %v864_v7 = vadd.f32 1.4214138, %v856_v55 }
 0x547   :  { %v877_v48 = vadd.f32 -0.28449672, %v869_v34  ;;  %v849_v56 = vadd.f32 -1.4531521, %v841_v49  ;;  %v870_v60 = vmul.f32 %v2771_v8, %v862_v63  ;;  %v842_v15 = vmul.f32 1.0614054, %v2802_v28  ;;  %v2810_v14 = vpop.eup %2326 }
 0x548   :  { %v879_v50 = vadd.f32 -0.28449672, %v871_v13  ;;  %v851_v17 = vadd.f32 -1.4531521, %v843_v51  ;;  %v872_v22 = vmul.f32 %v2775_v6, %v864_v7  ;;  %v2329_v25 = vpop.eup %2328  ;;  %v844_v29 = vmul.f32 1.0614054, %v2810_v14 }
 0x549   :  { %v885_v31 = vmul.f32 %v2760_v59, %v877_v48  ;;  %v878_v52 = vadd.f32 -0.28449672, %v870_v60  ;;  %v857_v10 = vmul.f32 %v2788_v36, %v849_v56  ;;  %v850_v12 = vadd.f32 -1.4531521, %v842_v15  ;;  %v2331_v33 = vpop.eup %2330 }
 0x54a   :  { %v887_v3 = vmul.f32 %v2765_v30, %v879_v50  ;;  %v859_v26 = vmul.f32 %v2794_v43, %v851_v17  ;;  %v880_v27 = vadd.f32 -0.28449672, %v872_v22  ;;  %v852_v48 = vadd.f32 -1.4531521, %v844_v29  ;;  %v2333_v49 = vpop.eup %2332 }
 0x54b   :  { %v893_v11 = vadd.f32 0.2548296, %v885_v31  ;;  %v886_v1 = vmul.f32 %v2771_v8, %v878_v52  ;;  %v921_v60 = vmul.f32 %v913_v0, %v2744_v44  ;;  %v939_v7 = vmul.f32 1.442695, %v924_v62  ;;  %v2335_v15 = vpop.eup %2334 }
 0x54c   :  { %v895_v18 = vadd.f32 0.2548296, %v887_v3  ;;  %v888_v38 = vmul.f32 %v2775_v6, %v880_v27  ;;  %v867_v55 = vadd.f32 1.4214138, %v859_v26  ;;  %v860_v56 = vmul.f32 %v2810_v14, %v852_v48 }
 0x54d   :  { %v901_v23 = vmul.f32 %v2760_v59, %v893_v11  ;;  %v894_v13 = vadd.f32 0.2548296, %v886_v1  ;;  %v858_v59 = vmul.f32 %v2802_v28, %v850_v12  ;;  %v923_v12 = vmul.f32 %v915_v20, %v2749_v46 }
 0x54e   :  { %v903_v9 = vmul.f32 %v2765_v30, %v895_v18  ;;  %v865_v30 = vadd.f32 1.4214138, %v857_v10  ;;  %v896_v31 = vadd.f32 0.2548296, %v888_v38  ;;  %v868_v52 = vadd.f32 1.4214138, %v860_v56  ;;  %v2337_v29 = vpop.eup %2336 }
 0x54f   :  { %v941_v34 = vmul.f32 %v2329_v25, %v901_v23  ;;  %v902_v50 = vmul.f32 %v2771_v8, %v894_v13  ;;  %v866_v51 = vadd.f32 1.4214138, %v858_v59  ;;  %v875_v44 = vmul.f32 %v2794_v43, %v867_v55 }
 0x550   :  { %v943_v40 = vmul.f32 %v2331_v33, %v903_v9  ;;  %v904_v11 = vmul.f32 %v2775_v6, %v896_v31  ;;  %v873_v18 = vmul.f32 %v2788_v36, %v865_v30  ;;  %2338 = vpow2.f32 %v939_v7  ;;  %v2229_v7 = vld [vmem:[#allocation7 + $0x1c8] sm:$0xff]  }
 0x551   :  { %v949_v63 = vsub.f32 1.0, %v941_v34  ;;  %v942_v3 = vmul.f32 %v2333_v49, %v902_v50  ;;  %v874_v17 = vmul.f32 %v2802_v28, %v866_v51  ;;  %v876_v25 = vmul.f32 %v2810_v14, %v868_v52 }
 0x552   :  { %v951_v53 = vsub.f32 1.0, %v943_v40  ;;  %v944_v0 = vmul.f32 %v2335_v15, %v904_v11  ;;  %v881_v9 = vadd.f32 -0.28449672, %v873_v18  ;;  %v933_v26 = vmul.f32 1.442695, %v921_v60  ;;  %v2227_v60 = vld [vmem:[#allocation7 + $0x180] sm:$0xff]  }
 0x553   :  { %v965_v61 = vsub.f32 0.0, %v949_v63  ;;  %v950_v21 = vsub.f32 1.0, %v942_v3  ;;  %v882_v22 = vadd.f32 -0.28449672, %v874_v17  ;;  %v883_v33 = vadd.f32 -0.28449672, %v875_v44 }
 0x554   :  { %v967_v58 = vsub.f32 0.0, %v951_v53  ;;  %v952_v57 = vsub.f32 1.0, %v944_v0  ;;  %v884_v46 = vadd.f32 -0.28449672, %v876_v25  ;;  %v784_v20 = vmul.f32 0.5, %v2706_v2  ;;  %v2228_v2 = vld [vmem:[#allocation7 + $0x148] sm:$0xff]  }
 0x555   :  { %v973_v8 = vsel %vm957_vm13, %v965_v61, %v949_v63  ;;  %v966_v1 = vsub.f32 0.0, %v950_v21  ;;  %v890_v6 = vmul.f32 %v2802_v28, %v882_v22  ;;  %v937_v40 = vmul.f32 1.442695, %v923_v12  ;;  %v2230_v11 = vld [vmem:[#allocation7 + $0x108] sm:$0xff]   ;;  %v2232_v15 = vld [vmem:[#allocation7 + $0x150] sm:$0xff]  }
 0x556   :  { %v981_v23 = vadd.f32 1.0, %v973_v8  ;;  %v975_v10 = vsel %vm959_vm14, %v967_v58, %v951_v53  ;;  %v968_v62 = vsub.f32 0.0, %v952_v57  ;;  %v889_v49 = vmul.f32 %v2788_v36, %v881_v9  ;;  %v2235_v9 = vld [vmem:[#allocation7 + $0x190] sm:$0xff]  }
 0x557   :  { %v974_v27 = vsel %vm958_vm15, %v966_v1, %v950_v21  ;;  %v898_v19 = vadd.f32 0.2548296, %v890_v6  ;;  %v983_v4 = vadd.f32 1.0, %v975_v10  ;;  %v892_v50 = vmul.f32 %v2810_v14, %v884_v46  ;;  %v2234_v6 = vld [vmem:[#allocation7 + $0x110] sm:$0xff]  }
 0x558   :  { %v982_v34 = vadd.f32 1.0, %v974_v27  ;;  %v989_v13 = vmul.f32 %v981_v23, %v2778_v24  ;;  %v976_v48 = vsel %vm960_vm0, %v968_v62, %v952_v57  ;;  %2340 = vpow2.f32 %v933_v26  ;;  %v2233_v23 = vld [vmem:[#allocation7 + $0x1d0] sm:$0xff]   ;;  %v2236_v57 = vld [vmem:[#allocation7 + $0x158] sm:$0xff]  }
 0x559   :  { %v906_v59 = vmul.f32 %v2802_v28, %v898_v19  ;;  %v984_v63 = vadd.f32 1.0, %v976_v48  ;;  %v991_v51 = vmul.f32 %v983_v4, %v2785_v35  ;;  %v891_v5 = vmul.f32 %v2794_v43, %v883_v33  ;;  %v2226_v28 = vld [vmem:[#allocation7 + $0x100] sm:$0xff]   ;;  %v2238_v4 = vld [vmem:[#allocation7 + $0x118] sm:$0xff]   ;;  %v2245_v48 = vld [vmem:[#allocation7 + $0x1e8] sm:$0xff]  }
 0x55a   :  { %v990_v38 = vmul.f32 %v982_v34, %v2792_v37  ;;  %v997_v53 = vpack.c.bf16 %v989_v13, %v989_v13  ;;  %v900_v56 = vadd.f32 0.2548296, %v892_v50  ;;  %2342 = vpow2.f32 %v937_v40  ;;  %v2339_v35 = vpop.eup %2338  ;;  %v2240_v34 = vld [vmem:[#allocation7 + $0x160] sm:$0xff]   ;;  %v2239_v62 = vld [vmem:[#allocation7 + $0x198] sm:$0xff]  }
 0x55b   :  { %v946_v30 = vmul.f32 %v2337_v29, %v906_v59  ;;  %v992_v55 = vmul.f32 %v984_v63, %v784_v20  ;;  %v897_v37 = vadd.f32 0.2548296, %v889_v49  ;;  %v999_v58 = vpack.c.bf16 %v991_v51, %v991_v51  ;;  %v2237_v29 = vld [vmem:[#allocation7 + $0x1d8] sm:$0xff]   ;;  %v2241_v59 = vld [vmem:[#allocation7 + $0x1e0] sm:$0xff]   ;;  %v2246_v63 = vld [vmem:[#allocation7 + $0x128] sm:$0xff]  }
 0x55c   :  { %v998_v24 = vpack.c.bf16 %v990_v38, %v990_v38  ;;  %v908_v17 = vmul.f32 %v2810_v14, %v900_v56  ;;  %v899_v52 = vadd.f32 0.2548296, %v891_v5  ;;  %v786_v21 = vmul.f32 0.5, %v2738_v42  ;;  %v2231_v14 = vld [vmem:[#allocation7 + $0x188] sm:$0xff]   ;;  %v2242_v20 = vld [vmem:[#allocation7 + $0x120] sm:$0xff]   ;;  %v2249_v5 = vld [vmem:[#allocation7 + $0x1f0] sm:$0xff]  }
 0x55d   :  { %v954_v31 = vsub.f32 1.0, %v946_v30  ;;  %v1000_v61 = vpack.c.bf16 %v992_v55, %v992_v55  ;;  %v905_v44 = vmul.f32 %v2788_v36, %v897_v37  ;;  %v788_v27 = vmul.f32 0.5, %v2746_v45  ;;  %v2244_v45 = vld [vmem:[#allocation7 + $0x168] sm:$0xff]   ;;  %v2243_v38 = vld [vmem:[#allocation7 + $0x1a0] sm:$0xff]   ;;  %v2248_v30 = vld [vmem:[#allocation7 + $0x170] sm:$0xff]  }
 0x55e   :  { %1556 = vmatprep.mubr.bf16.mxu0 %v998_v24  ;;  %v948_v18 = vmul.f32 %v2339_v35, %v908_v17  ;;  %v907_v10 = vmul.f32 %v2794_v43, %v899_v52  ;;  %v2247_v51 = vld [vmem:[#allocation7 + $0x1a8] sm:$0xff]   ;;  %v2252_v55 = vld [vmem:[#allocation7 + $0x178] sm:$0xff]  }
 0x55f   :  { %1557 = vmatmul.mubr.bf16.vlgmr.msra.gmra.mrb[8].mxu0 %v997_v53  ;;  %v970_v3 = vsub.f32 0.0, %v954_v31  ;;  %1596 = vmatprep.mubr.bf16.mxu1 %v1000_v61  ;;  %v2253_v56 = vld [vmem:[#allocation7 + $0x1f8] sm:$0xff]   ;;  %v2260_v52 = vld [vmem:[%s2900_s9 + $0x20] sm:$0xff]  }
 0x560   :  { %2047 = vmatpush3.bf16.msra.mxu0 %v2226_v28  ;;  %1597 = vmatmul.mubr.bf16.vlgmr.msra.gmra.mrb[12].mxu1 %v999_v58  ;;  %v956_v0 = vsub.f32 1.0, %v948_v18  ;;  %v2250_v28 = vld [vmem:[#allocation7 + $0x130] sm:$0xff]   ;;  %v2254_v37 = vld [vmem:[#allocation7 + $0x138] sm:$0xff]   ;;  %v2435_v58 = vmov 0.0  }
 0x561   :  { %2048 = vmatprep.subr.bf16.mxu0 %v2228_v2  ;;  %v978_v8 = vsel %vm962_vm1, %v970_v3, %v954_v31  ;;  %2069 = vmatpush3.bf16.msra.mxu1 %v2227_v60  ;;  %v2251_v2 = vld [vmem:[#allocation7 + $0x1b0] sm:$0xff]   ;;  %v785_v31 = vmul.f32 0.5, %v2731_v32  ;;  %v2255_v60 = vld [vmem:[#allocation7 + $0x1b8] sm:$0xff]   ;;  %v2256_v32 = vld [vmem:[%s2900_s9] sm:$0xff]  }
 0x562   :  { %v986_v22 = vadd.f32 1.0, %v978_v8  ;;  %2070 = vmatprep.subr.bf16.mxu1 %v2229_v7  ;;  %v972_v1 = vsub.f32 0.0, %v956_v0  ;;  %v2341_v12 = vpop.eup %2340  ;;  %v2258_v7 = vld [vmem:[%s2900_s9 + $0x10] sm:$0xff]   ;;  %v2263_v18 = vld [vmem:[%s2900_s9 + $0x38] sm:$0xff]  }
 0x563   :  { %v945_v25 = vmul.f32 %v2341_v12, %v905_v44  ;;  %v2262_v8 = vld [vmem:[%s2900_s9 + $0x30] sm:$0xff]  }
 0x564   :  { %2049 = vmatpush3.bf16.msra.mxu0 %v2230_v11  ;;  %v994_v47 = vmul.f32 %v986_v22, %v786_v21  ;;  %v980_v36 = vsel %vm964_vm2, %v972_v1, %v956_v0  ;;  %v2343_v26 = vpop.eup %2342  ;;  %v2259_v11 = vld [vmem:[%s2900_s9 + $0x18] sm:$0xff]   ;;  %v1908_v22 = vld [vmem:[%s2899_s8] ss:$0 sm:$0xff] }
 0x565   :  { %2050 = vmatprep.subr.bf16.mxu0 %v2232_v15  ;;  %2071 = vmatpush3.bf16.msra.mxu1 %v2231_v14  ;;  %v988_v19 = vadd.f32 1.0, %v980_v36  ;;  %v947_v43 = vmul.f32 %v2343_v26, %v907_v10  ;;  %v953_v54 = vsub.f32 1.0, %v945_v25  ;;  %v2261_v15 = vld [vmem:[%s2900_s9 + $0x28] sm:$0xff]  }
 0x566   :  { %v1002_v42 = vpack.c.bf16 %v994_v47, %v994_v47  ;;  %2072 = vmatprep.subr.bf16.mxu1 %v2233_v23 }
 0x567   :  { %v996_v33 = vmul.f32 %v988_v19, %v788_v27  ;;  %v955_v46 = vsub.f32 1.0, %v947_v43  ;;  %v969_v40 = vsub.f32 0.0, %v953_v54 }
 0x568   :  { %1636 = vmatprep.mubr.bf16.mxu0 %v1002_v42  ;;  %2051 = vmatpush3.bf16.msra.mxu0 %v2234_v6 }
 0x569   :  { %2052 = vmatprep.subr.bf16.mxu0 %v2236_v57  ;;  %2073 = vmatpush3.bf16.msra.mxu1 %v2235_v9  ;;  %v1004_v13 = vpack.c.bf16 %v996_v33, %v996_v33  ;;  %v971_v49 = vsub.f32 0.0, %v955_v46  ;;  %v977_v50 = vsel %vm961_vm3, %v969_v40, %v953_v54 }
 0x56a   :  { %2074 = vmatprep.subr.bf16.mxu1 %v2237_v29  ;;  %v985_v53 = vadd.f32 1.0, %v977_v50 }
 0x56b   :  { %1676 = vmatprep.mubr.bf16.mxu1 %v1004_v13  ;;  %v979_v24 = vsel %vm963_vm4, %v971_v49, %v955_v46 }
 0x56c   :  { %2053 = vmatpush3.bf16.msra.mxu0 %v2238_v4  ;;  %v987_v41 = vadd.f32 1.0, %v979_v24  ;;  %v993_v61 = vmul.f32 %v985_v53, %v785_v31 }
 0x56d   :  { %2054 = vmatprep.subr.bf16.mxu0 %v2240_v34  ;;  %2075 = vmatpush3.bf16.msra.mxu1 %v2239_v62 }
 0x56e   :  { %2076 = vmatprep.subr.bf16.mxu1 %v2241_v59  ;;  %v995_v3 = vmul.f32 %v987_v41, %v787_v39  ;;  %v1001_v17 = vpack.c.bf16 %v993_v61, %v993_v61 }
 0x570   :  { %2055 = vmatpush3.bf16.msra.mxu0 %v2242_v20  ;;  %v1003_v35 = vpack.c.bf16 %v995_v3, %v995_v3 }
 0x571   :  { %2056 = vmatprep.subr.bf16.mxu0 %v2244_v45  ;;  %2077 = vmatpush3.bf16.msra.mxu1 %v2243_v38 }
 0x572   :  { %2078 = vmatprep.subr.bf16.mxu1 %v2245_v48 }
 0x574   :  { %2057 = vmatpush3.bf16.msra.mxu0 %v2246_v63 }
 0x575   :  { %2058 = vmatprep.subr.bf16.mxu0 %v2248_v30  ;;  %2079 = vmatpush3.bf16.msra.mxu1 %v2247_v51 }
 0x576   :  { %2080 = vmatprep.subr.bf16.mxu1 %v2249_v5 }
 0x578   :  { %2059 = vmatpush3.bf16.msra.mxu0 %v2250_v28 }
 0x579   :  { %2060 = vmatprep.subr.bf16.mxu0 %v2252_v55  ;;  %2081 = vmatpush3.bf16.msra.mxu1 %v2251_v2 }
 0x57a   :  { %2082 = vmatprep.subr.bf16.mxu1 %v2253_v56 }
 0x57c   :  { %2061 = vmatpush3.bf16.msra.mxu0 %v2254_v37 }
 0x57d   :  { %2083 = vmatpush3.bf16.msra.mxu1 %v2255_v60  ;;  %2133 = vmatprep.subr.bf16.mxu0 %v2435_v58  ;;  %v1973_v60 = vld [vmem:[%s2901_s10] ss:$0 sm:$0xff] }
 0x57f   :  { %1637 = vmatmul.mubr.bf16.vlgmr.msra.gmra.mrb[12].mxu0 %v1001_v17 }
 0x580   :  { %1677 = vmatmul.mubr.bf16.vlgmr.msra.gmra.mrb[16].mxu1 %v1003_v35  ;;  %2134 = vmatpush3.bf16.msra.mxu0 %v2256_v32 }
 0x581   :  { %2135 = vmatprep.subr.bf16.mxu0 %v2435_v58  ;;  %2149 = vmatprep.mubr.msk.bf16.mxu0 %vm2436_vm5, %v2435_v58 }
 0x584   :  { %2136 = vmatpush3.bf16.msra.mxu0 %v2257_v16 }
 0x585   :  { %2137 = vmatprep.subr.bf16.mxu0 %v2435_v58 }
 0x588   :  { %2138 = vmatpush3.bf16.msra.mxu0 %v2258_v7 }
 0x589   :  { %2139 = vmatprep.subr.bf16.mxu0 %v2435_v58 }
 0x58c   :  { %2140 = vmatpush3.bf16.msra.mxu0 %v2259_v11 }
 0x58d   :  { %2141 = vmatprep.subr.bf16.mxu0 %v2435_v58 }
 0x590   :  { %2142 = vmatpush3.bf16.msra.mxu0 %v2260_v52 }
 0x591   :  { %2143 = vmatprep.subr.bf16.mxu0 %v2435_v58 }
 0x594   :  { %2144 = vmatpush3.bf16.msra.mxu0 %v2261_v15 }
 0x595   :  { %2145 = vmatprep.subr.bf16.mxu0 %v2435_v58 }
 0x598   :  { %2146 = vmatpush3.bf16.msra.mxu0 %v2262_v8 }
 0x599   :  { %2147 = vmatprep.subr.bf16.mxu0 %v2435_v58 }
 0x59c   :  { %2148 = vmatpush3.bf16.msra.mxu0 %v2263_v18 }
 0x632   :  { %v2018_v21 = vpop.f32.mrb[8].mxu0 }
 0x633   :  { %v2019_v44 = vpop.f32.mrb[9].mxu0  ;;  %v2040_v47 = vpop.f32.mrb[12].mxu1 }
 0x634   :  { %v2020_v14 = vadd.f32 %v2019_v44, %v2018_v21  ;;  %v2021_v0 = vpop.f32.mrb[10].mxu0  ;;  %v2041_v1 = vpop.f32.mrb[13].mxu1 }
 0x635   :  { %v2022_v23 = vpop.f32.mrb[11].mxu0  ;;  %v2042_v6 = vadd.f32 %v2041_v1, %v2040_v47  ;;  %v2043_v12 = vpop.f32.mrb[14].mxu1 }
 0x636   :  { %v1559_v10 = vadd.f32 %v2020_v14, %v1908_v22  ;;  %v2044_v42 = vpop.f32.mrb[15].mxu1 }
 0x638   :  { %v1599_v57 = vadd.f32 %v2042_v6, %v1559_v10 }
 0x652   :  { %v2062_v25 = vpop.f32.mrb[12].mxu0 }
 0x653   :  { %v2063_v36 = vpop.f32.mrb[13].mxu0  ;;  %v2084_v9 = vpop.f32.mrb[16].mxu1 }
 0x654   :  { %v2064_v26 = vadd.f32 %v2063_v36, %v2062_v25  ;;  %v2065_v27 = vpop.f32.mrb[14].mxu0  ;;  %v2085_v19 = vpop.f32.mrb[17].mxu1 }
 0x655   :  { %v2066_v29 = vpop.f32.mrb[15].mxu0  ;;  %v2086_v4 = vadd.f32 %v2085_v19, %v2084_v9  ;;  %v2087_v33 = vpop.f32.mrb[18].mxu1  ;;  %v1982_v27 = vld [vmem:[%s2902_s11] ss:$0 sm:$0xff] }
 0x656   :  { %v1639_v43 = vadd.f32 %v2064_v26, %v1599_v57  ;;  %v2088_v34 = vpop.f32.mrb[19].mxu1 }
 0x658   :  { %v1679_v54 = vadd.f32 %v2086_v4, %v1639_v43  ;;  %v1983_v4 = vld [vmem:[#allocation2] ss:$0 sm:$0xff] }
 0x65a   :  { %v1685_v62 = vmul.f32 0.70710677, %v1679_v54  ;;  %v1684_v56 = vmul.f32 0.5, %v1679_v54 }
 0x65c   :  { %v1686_v13 = vand.u32 2147483647, %v1685_v62  ;;  %vm1706_vm6 = vcmp.lt.f32.partialorder %v1685_v62, 0.0 }
 0x65e   :  { %v1687_v59 = vmul.f32 0.3275911, %v1686_v13  ;;  %v1700_v20 = vsub.f32 0.0, %v1686_v13 }
 0x660   :  { %v1688_v46 = vadd.f32 1.0, %v1687_v59  ;;  %v1701_v40 = vmul.f32 %v1700_v20, %v1686_v13 }
 0x662   :  { %2344 = vrcp.f32 %v1688_v46  ;;  %v1702_v49 = vmul.f32 1.442695, %v1701_v40 }
 0x664   :  { %2346 = vpow2.f32 %v1702_v49 }
 0x66c   :  { %v2345_v45 = vpop.eup %2344 }
 0x66d   :  { %v1691_v38 = vmul.f32 1.0614054, %v2345_v45 }
 0x66e   :  { %v2347_v53 = vpop.eup %2346 }
 0x66f   :  { %v1692_v48 = vadd.f32 -1.4531521, %v1691_v38 }
 0x671   :  { %v1693_v63 = vmul.f32 %v2345_v45, %v1692_v48 }
 0x673   :  { %v1694_v30 = vadd.f32 1.4214138, %v1693_v63 }
 0x675   :  { %v1695_v50 = vmul.f32 %v2345_v45, %v1694_v30 }
 0x677   :  { %v1696_v51 = vadd.f32 -0.28449672, %v1695_v50 }
 0x679   :  { %v1697_v5 = vmul.f32 %v2345_v45, %v1696_v51 }
 0x67b   :  { %v1698_v24 = vadd.f32 0.2548296, %v1697_v5 }
 0x67d   :  { %v1699_v28 = vmul.f32 %v2345_v45, %v1698_v24 }
 0x67f   :  { %v1704_v55 = vmul.f32 %v2347_v53, %v1699_v28 }
 0x681   :  { %v1705_v2 = vsub.f32 1.0, %v1704_v55 }
 0x683   :  { %v1707_v31 = vsub.f32 0.0, %v1705_v2 }
 0x685   :  { %v1708_v41 = vsel %vm1706_vm6, %v1707_v31, %v1705_v2 }
 0x686   :  { %v1709_v37 = vadd.f32 1.0, %v1708_v41 }
 0x688   :  { %v1710_v61 = vmul.f32 %v1709_v37, %v1684_v56 }
 0x68a   :  { %v1711_v39 = vpack.c.bf16 %v1710_v61, %v1710_v61 }
 0x68c   :  { %2150 = vmatmul.mubr.bf16.vlgmr.msra.gmra.mrb[16].mxu0 %v1711_v39 }
 0x75f   :  { %v1817_v3 = vpop.f32.mrb[16].mxu0 }
 0x760   :  { %v1818_v17 = vadd.f32 %v1973_v60, %v1817_v3  ;;  %v2151_v35 = vpop.f32.mrb[17].mxu0 }
 0x761   :  { %v1820_v32 = vpop.f32.mrb[18].mxu0 }
 0x762   :  { %v1824_v58 = vmul.f32 0.70710677, %v1818_v17  ;;  %v2152_v16 = vpop.f32.mrb[19].mxu0  ;;  %v1823_v9 = vmul.f32 0.5, %v1818_v17 }
 0x764   :  { %v1825_v7 = vand.u32 2147483647, %v1824_v58  ;;  %vm1845_vm7 = vcmp.lt.f32.partialorder %v1824_v58, 0.0 }
 0x766   :  { %v1826_v11 = vmul.f32 0.3275911, %v1825_v7  ;;  %v1839_v15 = vsub.f32 0.0, %v1825_v7 }
 0x768   :  { %v1827_v52 = vadd.f32 1.0, %v1826_v11  ;;  %v1840_v18 = vmul.f32 %v1839_v15, %v1825_v7 }
 0x76a   :  { %2348 = vrcp.f32 %v1827_v52  ;;  %v1841_v44 = vmul.f32 1.442695, %v1840_v18 }
 0x76c   :  { %2350 = vpow2.f32 %v1841_v44 }
 0x774   :  { %v2349_v8 = vpop.eup %2348 }
 0x775   :  { %v1830_v21 = vmul.f32 1.0614054, %v2349_v8 }
 0x776   :  { %v2351_v12 = vpop.eup %2350 }
 0x777   :  { %v1831_v22 = vadd.f32 -1.4531521, %v1830_v21 }
 0x779   :  { %v1832_v14 = vmul.f32 %v2349_v8, %v1831_v22 }
 0x77b   :  { %v1833_v0 = vadd.f32 1.4214138, %v1832_v14 }
 0x77d   :  { %v1834_v47 = vmul.f32 %v2349_v8, %v1833_v0 }
 0x77f   :  { %v1835_v23 = vadd.f32 -0.28449672, %v1834_v47 }
 0x781   :  { %v1836_v10 = vmul.f32 %v2349_v8, %v1835_v23 }
 0x783   :  { %v1837_v1 = vadd.f32 0.2548296, %v1836_v10 }
 0x785   :  { %v1838_v6 = vmul.f32 %v2349_v8, %v1837_v1 }
 0x787   :  { %v1843_v42 = vmul.f32 %v2351_v12, %v1838_v6 }
 0x789   :  { %v1844_v57 = vsub.f32 1.0, %v1843_v42 }
 0x78b   :  { %v1846_v25 = vsub.f32 0.0, %v1844_v57 }
 0x78d   :  { %v1847_v36 = vsel %vm1845_vm7, %v1846_v25, %v1844_v57 }
 0x78e   :  { %v1848_v26 = vadd.f32 1.0, %v1847_v36 }
 0x790   :  { %v1849_v19 = vmul.f32 %v1848_v26, %v1823_v9 }
 0x792   :  { %v1857_v29 = vmul.f32 %v1982_v27, %v1849_v19 }
 0x794   :  { %v1859_v43 = vsel %vm1858_vm8, %v1857_v29, 0.0 }
 0x795   :  { %1860 = vadd.xlane.f32.xlu0 %v1859_v43 }
 0x822   :  { %v1861_v33 = vpop.xlane.xlu0 %1860 }
 0x823   :  { %v1869_v34 = vadd.f32 %v1983_v4, %v1861_v33 }
 0x825   :  { %1871 = vst.msk [vmem:[%s2904_s13] sm:$0xff] %vm1870_vm9, %v1869_v34 }
 0x826   :  { %1876 = vsyncpa [#allocation4], 1 }
 0x827   :  { %1877 = vsyncpa [#allocation6], 1 }

</bundles_post_ra>
